<compile_context>
chip_gen: v5e
topology: v5e:2x2
jax: 0.10.0
libtpu: 0.0.40
codegen_flags: <defaults>
</compile_context>

<pallas_src>
import jax
import jax.numpy as jnp
from jax.experimental import pallas as pl
from jax.experimental.pallas import tpu as pltpu

# ---- cfg (synthetic, deterministic) -----------------------------------------
NUM_LAYER = 2          # cfg.MODEL.NUM_LAYER
IN_CHANNEL = 16        # cfg.MODEL.IN_CHANNEL
HIDDEN_CHANNEL = 32    # cfg.MODEL.HIDDEN_CHANNEL
NUM_CENTROIDS = 8      # cfg.NUM_CENTROIDS

NUM_NODES = 64         # nodes per METIS subgraph
NUM_EDGES = 256
NUM_SUBGRAPHS = 8      # batch of subgraphs processed in one call

LANE = 128                      # lane-pad every feature axis to 128
N_GCN = NUM_LAYER + 1           # encoder returns n_layers+1 tensors
GROUP = 4                       # subgraphs packed per grid step (v5e: 2 already fills its 128-row MXU)
GN = GROUP * NUM_NODES          # 256 MXU rows per pass on v6e/v7x
MATMUL_DTYPE = jnp.bfloat16     # MXU operand dtype (f32 accumulation)


# ---- fused Pallas kernel -----------------------------------------------------
def fused_forward_kernel(a_ref, x_ref, w_ref, b_ref, fcw_ref, fcb_ref, o_ref):
    # a_ref   : [GN, GN]       bf16 block-diagonal normalized adjacency (GROUP subgraphs)
    # x_ref   : [GN, 128]      bf16 lane-padded node features (GROUP subgraphs stacked)
    # w_ref   : [3, 128, 128]  bf16 per-layer GCN weights, zero-padded (resident)
    # b_ref   : [3, 1, 128]    f32  per-layer biases, zero-padded (resident)
    # fcw_ref : [3, 128, 128]  bf16 fc weight, split per layer slot (resident)
    # fcb_ref : [1, 128]       f32  fc bias, zero-padded (resident)
    # o_ref   : [GN, 128]      f32  lane-padded logits
    a = a_ref[...]
    h = x_ref[...]
    acc = jnp.zeros(o_ref.shape, jnp.float32)
    for l in range(N_GCN):                               # static unroll (3 layers)
        hw = jnp.dot(h, w_ref[l], preferred_element_type=jnp.float32)
        ah = jnp.dot(a, hw.astype(MATMUL_DTYPE),
                     preferred_element_type=jnp.float32)
        h = jnp.maximum(ah + b_ref[l], 0.0).astype(MATMUL_DTYPE)
        # fc contribution of this layer's slab slot (replaces the hcat scratch).
        acc = acc + jnp.dot(h, fcw_ref[l], preferred_element_type=jnp.float32)
    o_ref[...] = acc + fcb_ref[...]


# ---- wrapper ------------------------------------------------------------------
def _block_diag(a, group):
    # (B, N, N) -> (B//group, group*N, group*N) block diagonal.
    nb, n = a.shape[0] // group, a.shape[1]
    a = a.reshape(nb, group, n, n)
    eye = jnp.eye(group, dtype=a.dtype)
    out = jnp.einsum("bgij,gh->bgihj", a, eye)
    return out.reshape(nb, group * n, group * n)


@jax.jit
def node_classification_forward(a_hat, x_s, params):
    # a_hat: (B, N, N) f32 normalized adjacencies (precomputed once per graph batch)
    # x_s  : (B, N, IN_CHANNEL) f32 node features
    b, n, _ = x_s.shape
    b_pad = ((b + GROUP - 1) // GROUP) * GROUP           # pad batch to GROUP multiple
    a_hat = jnp.pad(a_hat, ((0, b_pad - b), (0, 0), (0, 0)))
    x_s = jnp.pad(x_s, ((0, b_pad - b), (0, 0), (0, 0)))

    # bf16 pre-cast + packing done once in the wrapper (outside the kernel).
    a_blk = _block_diag(a_hat.astype(MATMUL_DTYPE), GROUP)         # (nb, GN, GN)
    x_pad = jnp.zeros((b_pad, n, LANE), MATMUL_DTYPE)
    x_pad = x_pad.at[:, :, :IN_CHANNEL].set(x_s.astype(MATMUL_DTYPE))
    x_blk = x_pad.reshape(b_pad // GROUP, GROUP * n, LANE)         # (nb, GN, 128)

    nb = b_pad // GROUP
    gn = GROUP * n

    flops_per_step = N_GCN * (2 * gn * LANE * LANE       # h @ W
                              + 2 * gn * gn * LANE       # A @ (hW)
                              + 2 * gn * LANE * LANE)    # fc accumulation
    bytes_per_step = gn * gn * 2 + gn * LANE * 2 + gn * LANE * 4
    weight_bytes = ((params["w"].size + params["fc_w"].size) * 2
                    + (params["b"].size + params["fc_b"].size) * 4)

    out_blk = pl.pallas_call(
        fused_forward_kernel,
        out_shape=jax.ShapeDtypeStruct((nb, gn, LANE), jnp.float32),
        grid=(nb,),
        in_specs=[
            pl.BlockSpec((pl.Squeezed(), gn, gn), lambda i: (i, 0, 0)),
            pl.BlockSpec((pl.Squeezed(), gn, LANE), lambda i: (i, 0, 0)),
            pl.BlockSpec((N_GCN, LANE, LANE), lambda i: (0, 0, 0)),   # resident weights
            pl.BlockSpec((N_GCN, 1, LANE), lambda i: (0, 0, 0)),
            pl.BlockSpec((N_GCN, LANE, LANE), lambda i: (0, 0, 0)),
            pl.BlockSpec((1, LANE), lambda i: (0, 0)),
        ],
        out_specs=pl.BlockSpec((pl.Squeezed(), gn, LANE), lambda i: (i, 0, 0)),
        compiler_params=pltpu.CompilerParams(
            dimension_semantics=("parallel",)),      # shards grid across TCs on v7x
        cost_estimate=pl.CostEstimate(
            flops=flops_per_step * nb,
            transcendentals=0,
            bytes_accessed=bytes_per_step * nb + weight_bytes),
    )(a_blk, x_blk, params["w"], params["b"], params["fc_w"], params["fc_b"])
    # Per-step VMEM (double buffered): ~0.9 MiB << 32 MiB default scoped limit,
    # safe on v7x's 64 MiB as well; no vmem_limit_bytes override needed.

    out = out_blk.reshape(b_pad, n, LANE)
    return out[:b, :, :NUM_CENTROIDS]


# ---- glue (plain JAX): adjacency normalization + padded params ---------------
def normalized_adjacency(edge_index, num_nodes):
    # Hoisted out of forward: depends only on the graph, computed once.
    src, dst = edge_index[0], edge_index[1]
    a = jnp.zeros((num_nodes, num_nodes), jnp.float32)
    a = a.at[dst, src].set(1.0)
    a = a.at[src, dst].set(1.0)                         # undirected
    eye = jnp.eye(num_nodes, dtype=jnp.float32)
    a = jnp.maximum(a, eye)                             # A + I (no double self loops)
    deg = a.sum(axis=-1)
    d_inv_sqrt = jnp.where(deg > 0, 1.0 / jnp.sqrt(deg), 0.0)
    return d_inv_sqrt[:, None] * a * d_inv_sqrt[None, :]


def init_params(key):
    # Logical-shape weights, zero-padded once to the lane-dense bf16 layout.
    dims = [IN_CHANNEL] + [HIDDEN_CHANNEL] * N_GCN
    w = jnp.zeros((N_GCN, LANE, LANE), jnp.float32)
    b = jnp.zeros((N_GCN, 1, LANE), jnp.float32)        # zero biases (nn.Linear-style)
    for l in range(N_GCN):
        key, k = jax.random.split(key)
        scale = 1.0 / jnp.sqrt(jnp.float32(dims[l]))
        wl = jax.random.normal(k, (dims[l], dims[l + 1]), jnp.float32) * scale
        w = w.at[l, :dims[l], :dims[l + 1]].set(wl)

    fc_in = HIDDEN_CHANNEL * N_GCN
    key, k = jax.random.split(key)
    fcw = jax.random.normal(k, (fc_in, NUM_CENTROIDS), jnp.float32) \
        / jnp.sqrt(jnp.float32(fc_in))
    fc_w = jnp.zeros((N_GCN, LANE, LANE), jnp.float32)  # per-layer fc slab slot
    for l in range(N_GCN):
        fc_w = fc_w.at[l, :HIDDEN_CHANNEL, :NUM_CENTROIDS].set(
            fcw[l * HIDDEN_CHANNEL:(l + 1) * HIDDEN_CHANNEL, :])
    fc_b = jnp.zeros((1, LANE), jnp.float32)
    return {"w": w.astype(MATMUL_DTYPE), "b": b,
            "fc_w": fc_w.astype(MATMUL_DTYPE), "fc_b": fc_b}


def reference_forward(a_hat, x_s, params):
    # Pure-JAX reference mirroring the kernel's bf16-operand / f32-accum path.
    def one(a, x):
        a = a.astype(MATMUL_DTYPE)
        h = jnp.zeros((x.shape[0], LANE), MATMUL_DTYPE)
        h = h.at[:, :IN_CHANNEL].set(x.astype(MATMUL_DTYPE))
        acc = jnp.zeros((x.shape[0], LANE), jnp.float32)
        for l in range(N_GCN):
            hw = jnp.dot(h, params["w"][l], preferred_element_type=jnp.float32)
            ah = jnp.dot(a, hw.astype(MATMUL_DTYPE),
                         preferred_element_type=jnp.float32)
            h = jnp.maximum(ah + params["b"][l], 0.0).astype(MATMUL_DTYPE)
            acc = acc + jnp.dot(h, params["fc_w"][l],
                                preferred_element_type=jnp.float32)
        return acc + params["fc_b"]
    return jax.vmap(one)(a_hat, x_s)[:, :, :NUM_CENTROIDS]


# ---- main ---------------------------------------------------------------------
if __name__ == "__main__":
    key = jax.random.PRNGKey(0)
    key, kx, ke = jax.random.split(key, 3)
    x_s = jax.random.normal(
        kx, (NUM_SUBGRAPHS, NUM_NODES, IN_CHANNEL), jnp.float32)
    edge_index_s = jax.random.randint(
        ke, (NUM_SUBGRAPHS, 2, NUM_EDGES), 0, NUM_NODES, dtype=jnp.int32)

    params = init_params(key)
    # TODO(synk): Encoder source unavailable; GCN-style symmetric normalization assumed.
    a_hat = jax.vmap(lambda e: normalized_adjacency(e, NUM_NODES))(edge_index_s)

    out = node_classification_forward(a_hat, x_s, params)
    jax.block_until_ready(out)
    assert out.shape == (NUM_SUBGRAPHS, NUM_NODES, NUM_CENTROIDS)

    ref = reference_forward(a_hat, x_s, params)
    assert jnp.allclose(out, ref, atol=5e-2, rtol=5e-2), \
        float(jnp.max(jnp.abs(out - ref)))
    print("KERNEL_OK")
</pallas_src>

<mosaic_0001>
module attributes {stable_mosaic.version = 11 : i64} {
  func.func @fused_forward_kernel(%arg0: i32, %arg1: memref<1x256x256xbf16, #tpu.memory_space<vmem>>, %arg2: memref<1x256x128xbf16, #tpu.memory_space<vmem>>, %arg3: memref<3x128x128xbf16, #tpu.memory_space<vmem>>, %arg4: memref<3x1x128xf32, #tpu.memory_space<vmem>>, %arg5: memref<3x128x128xbf16, #tpu.memory_space<vmem>>, %arg6: memref<1x128xf32, #tpu.memory_space<vmem>>, %arg7: memref<1x256x128xf32, #tpu.memory_space<vmem>>) attributes {dimension_semantics = [#tpu.dimension_semantics<parallel>], iteration_bounds = array<i64: 2>, scalar_prefetch = 0 : i64, scratch_operands = 0 : i64, tpu.core_type = #tpu.core_type<tc>, window_params = [{transform_indices = @transform_0, window_bounds = array<i64: 1, 256, 256>}, {transform_indices = @transform_1, window_bounds = array<i64: 1, 256, 128>}, {pipeline_mode = #tpu.pipeline_mode<synchronous>, transform_indices = @transform_2, window_bounds = array<i64: 3, 128, 128>}, {pipeline_mode = #tpu.pipeline_mode<synchronous>, transform_indices = @transform_3, window_bounds = array<i64: 3, 1, 128>}, {pipeline_mode = #tpu.pipeline_mode<synchronous>, transform_indices = @transform_4, window_bounds = array<i64: 3, 128, 128>}, {pipeline_mode = #tpu.pipeline_mode<synchronous>, transform_indices = @transform_5, window_bounds = array<i64: 1, 128>}, {transform_indices = @transform_6, window_bounds = array<i64: 1, 256, 128>}]} {
    %c0 = arith.constant 0 : index
    %c0_0 = arith.constant 0 : index
    %c0_1 = arith.constant 0 : index
    %0 = vector.load %arg1[%c0, %c0_0, %c0_1] : memref<1x256x256xbf16, #tpu.memory_space<vmem>>, vector<1x256x256xbf16>
    %1 = vector.shape_cast %0 : vector<1x256x256xbf16> to vector<256x256xbf16>
    %c0_2 = arith.constant 0 : index
    %c0_3 = arith.constant 0 : index
    %c0_4 = arith.constant 0 : index
    %2 = vector.load %arg2[%c0_2, %c0_3, %c0_4] : memref<1x256x128xbf16, #tpu.memory_space<vmem>>, vector<1x256x128xbf16>
    %3 = vector.shape_cast %2 : vector<1x256x128xbf16> to vector<256x128xbf16>
    %cst = arith.constant 0.000000e+00 : f32
    %4 = vector.broadcast %cst : f32 to vector<256x128xf32>
    %c0_5 = arith.constant 0 : index
    %c0_6 = arith.constant 0 : index
    %c0_7 = arith.constant 0 : index
    %5 = vector.load %arg3[%c0_5, %c0_6, %c0_7] : memref<3x128x128xbf16, #tpu.memory_space<vmem>>, vector<1x128x128xbf16>
    %6 = vector.shape_cast %5 : vector<1x128x128xbf16> to vector<128x128xbf16>
    %cst_8 = arith.constant dense<0.000000e+00> : vector<256x128xf32>
    %7 = tpu.matmul %3, %6, %cst_8 {dimension_numbers = #tpu.dot_dimension_numbers<[1], [0], [0], [1], [0, 0, 1, 1], [], []>} : vector<256x128xbf16>, vector<128x128xbf16>, vector<256x128xf32> -> vector<256x128xf32>
    %8 = arith.truncf %7 : vector<256x128xf32> to vector<256x128xbf16>
    %cst_9 = arith.constant dense<0.000000e+00> : vector<256x128xf32>
    %9 = tpu.matmul %1, %8, %cst_9 {dimension_numbers = #tpu.dot_dimension_numbers<[1], [0], [0], [1], [0, 0, 1, 1], [], []>} : vector<256x256xbf16>, vector<256x128xbf16>, vector<256x128xf32> -> vector<256x128xf32>
    %c0_10 = arith.constant 0 : index
    %c0_11 = arith.constant 0 : index
    %c0_12 = arith.constant 0 : index
    %10 = vector.load %arg4[%c0_10, %c0_11, %c0_12] : memref<3x1x128xf32, #tpu.memory_space<vmem>>, vector<1x1x128xf32>
    %11 = vector.shape_cast %10 : vector<1x1x128xf32> to vector<1x128xf32>
    %12 = vector.broadcast %11 : vector<1x128xf32> to vector<256x128xf32>
    %13 = arith.addf %9, %12 : vector<256x128xf32>
    %cst_13 = arith.constant 0.000000e+00 : f32
    %14 = vector.broadcast %cst_13 : f32 to vector<256x128xf32>
    %15 = arith.maximumf %13, %14 : vector<256x128xf32>
    %16 = arith.truncf %15 : vector<256x128xf32> to vector<256x128xbf16>
    %c0_14 = arith.constant 0 : index
    %c0_15 = arith.constant 0 : index
    %c0_16 = arith.constant 0 : index
    %17 = vector.load %arg5[%c0_14, %c0_15, %c0_16] : memref<3x128x128xbf16, #tpu.memory_space<vmem>>, vector<1x128x128xbf16>
    %18 = vector.shape_cast %17 : vector<1x128x128xbf16> to vector<128x128xbf16>
    %cst_17 = arith.constant dense<0.000000e+00> : vector<256x128xf32>
    %19 = tpu.matmul %16, %18, %cst_17 {dimension_numbers = #tpu.dot_dimension_numbers<[1], [0], [0], [1], [0, 0, 1, 1], [], []>} : vector<256x128xbf16>, vector<128x128xbf16>, vector<256x128xf32> -> vector<256x128xf32>
    %20 = arith.addf %4, %19 : vector<256x128xf32>
    %c1 = arith.constant 1 : index
    %c0_18 = arith.constant 0 : index
    %c0_19 = arith.constant 0 : index
    %21 = vector.load %arg3[%c1, %c0_18, %c0_19] : memref<3x128x128xbf16, #tpu.memory_space<vmem>>, vector<1x128x128xbf16>
    %22 = vector.shape_cast %21 : vector<1x128x128xbf16> to vector<128x128xbf16>
    %cst_20 = arith.constant dense<0.000000e+00> : vector<256x128xf32>
    %23 = tpu.matmul %16, %22, %cst_20 {dimension_numbers = #tpu.dot_dimension_numbers<[1], [0], [0], [1], [0, 0, 1, 1], [], []>} : vector<256x128xbf16>, vector<128x128xbf16>, vector<256x128xf32> -> vector<256x128xf32>
    %24 = arith.truncf %23 : vector<256x128xf32> to vector<256x128xbf16>
    %cst_21 = arith.constant dense<0.000000e+00> : vector<256x128xf32>
    %25 = tpu.matmul %1, %24, %cst_21 {dimension_numbers = #tpu.dot_dimension_numbers<[1], [0], [0], [1], [0, 0, 1, 1], [], []>} : vector<256x256xbf16>, vector<256x128xbf16>, vector<256x128xf32> -> vector<256x128xf32>
    %c1_22 = arith.constant 1 : index
    %c0_23 = arith.constant 0 : index
    %c0_24 = arith.constant 0 : index
    %26 = vector.load %arg4[%c1_22, %c0_23, %c0_24] : memref<3x1x128xf32, #tpu.memory_space<vmem>>, vector<1x1x128xf32>
    %27 = vector.shape_cast %26 : vector<1x1x128xf32> to vector<1x128xf32>
    %28 = vector.broadcast %27 : vector<1x128xf32> to vector<256x128xf32>
    %29 = arith.addf %25, %28 : vector<256x128xf32>
    %cst_25 = arith.constant 0.000000e+00 : f32
    %30 = vector.broadcast %cst_25 : f32 to vector<256x128xf32>
    %31 = arith.maximumf %29, %30 : vector<256x128xf32>
    %32 = arith.truncf %31 : vector<256x128xf32> to vector<256x128xbf16>
    %c1_26 = arith.constant 1 : index
    %c0_27 = arith.constant 0 : index
    %c0_28 = arith.constant 0 : index
    %33 = vector.load %arg5[%c1_26, %c0_27, %c0_28] : memref<3x128x128xbf16, #tpu.memory_space<vmem>>, vector<1x128x128xbf16>
    %34 = vector.shape_cast %33 : vector<1x128x128xbf16> to vector<128x128xbf16>
    %cst_29 = arith.constant dense<0.000000e+00> : vector<256x128xf32>
    %35 = tpu.matmul %32, %34, %cst_29 {dimension_numbers = #tpu.dot_dimension_numbers<[1], [0], [0], [1], [0, 0, 1, 1], [], []>} : vector<256x128xbf16>, vector<128x128xbf16>, vector<256x128xf32> -> vector<256x128xf32>
    %36 = arith.addf %20, %35 : vector<256x128xf32>
    %c2 = arith.constant 2 : index
    %c0_30 = arith.constant 0 : index
    %c0_31 = arith.constant 0 : index
    %37 = vector.load %arg3[%c2, %c0_30, %c0_31] : memref<3x128x128xbf16, #tpu.memory_space<vmem>>, vector<1x128x128xbf16>
    %38 = vector.shape_cast %37 : vector<1x128x128xbf16> to vector<128x128xbf16>
    %cst_32 = arith.constant dense<0.000000e+00> : vector<256x128xf32>
    %39 = tpu.matmul %32, %38, %cst_32 {dimension_numbers = #tpu.dot_dimension_numbers<[1], [0], [0], [1], [0, 0, 1, 1], [], []>} : vector<256x128xbf16>, vector<128x128xbf16>, vector<256x128xf32> -> vector<256x128xf32>
    %40 = arith.truncf %39 : vector<256x128xf32> to vector<256x128xbf16>
    %cst_33 = arith.constant dense<0.000000e+00> : vector<256x128xf32>
    %41 = tpu.matmul %1, %40, %cst_33 {dimension_numbers = #tpu.dot_dimension_numbers<[1], [0], [0], [1], [0, 0, 1, 1], [], []>} : vector<256x256xbf16>, vector<256x128xbf16>, vector<256x128xf32> -> vector<256x128xf32>
    %c2_34 = arith.constant 2 : index
    %c0_35 = arith.constant 0 : index
    %c0_36 = arith.constant 0 : index
    %42 = vector.load %arg4[%c2_34, %c0_35, %c0_36] : memref<3x1x128xf32, #tpu.memory_space<vmem>>, vector<1x1x128xf32>
    %43 = vector.shape_cast %42 : vector<1x1x128xf32> to vector<1x128xf32>
    %44 = vector.broadcast %43 : vector<1x128xf32> to vector<256x128xf32>
    %45 = arith.addf %41, %44 : vector<256x128xf32>
    %cst_37 = arith.constant 0.000000e+00 : f32
    %46 = vector.broadcast %cst_37 : f32 to vector<256x128xf32>
    %47 = arith.maximumf %45, %46 : vector<256x128xf32>
    %48 = arith.truncf %47 : vector<256x128xf32> to vector<256x128xbf16>
    %c2_38 = arith.constant 2 : index
    %c0_39 = arith.constant 0 : index
    %c0_40 = arith.constant 0 : index
    %49 = vector.load %arg5[%c2_38, %c0_39, %c0_40] : memref<3x128x128xbf16, #tpu.memory_space<vmem>>, vector<1x128x128xbf16>
    %50 = vector.shape_cast %49 : vector<1x128x128xbf16> to vector<128x128xbf16>
    %cst_41 = arith.constant dense<0.000000e+00> : vector<256x128xf32>
    %51 = tpu.matmul %48, %50, %cst_41 {dimension_numbers = #tpu.dot_dimension_numbers<[1], [0], [0], [1], [0, 0, 1, 1], [], []>} : vector<256x128xbf16>, vector<128x128xbf16>, vector<256x128xf32> -> vector<256x128xf32>
    %52 = arith.addf %36, %51 : vector<256x128xf32>
    %c0_42 = arith.constant 0 : index
    %c0_43 = arith.constant 0 : index
    %53 = vector.load %arg6[%c0_42, %c0_43] : memref<1x128xf32, #tpu.memory_space<vmem>>, vector<1x128xf32>
    %54 = vector.broadcast %53 : vector<1x128xf32> to vector<256x128xf32>
    %55 = arith.addf %52, %54 : vector<256x128xf32>
    %c0_44 = arith.constant 0 : index
    %c0_45 = arith.constant 0 : index
    %c0_46 = arith.constant 0 : index
    %56 = vector.load %arg7[%c0_44, %c0_45, %c0_46] : memref<1x256x128xf32, #tpu.memory_space<vmem>>, vector<1x256x128xf32>
    %57 = vector.shape_cast %56 : vector<1x256x128xf32> to vector<256x128xf32>
    %58 = vector.shape_cast %55 : vector<256x128xf32> to vector<1x256x128xf32>
    tpu.vector_store %arg7[%c0_44, %c0_45, %c0_46], %58 {strides = array<i32>} : memref<1x256x128xf32, #tpu.memory_space<vmem>>, vector<1x256x128xf32>,
    return
  }
  func.func @transform_0(%arg0: i32) -> (i32, i32, i32) {
    %c0_i32 = arith.constant 0 : i32
    %c0_i32_0 = arith.constant 0 : i32
    %c0_i32_1 = arith.constant 0 : i32
    return %arg0, %c0_i32, %c0_i32_0 : i32, i32, i32
  }
  func.func @transform_1(%arg0: i32) -> (i32, i32, i32) {
    %c0_i32 = arith.constant 0 : i32
    %c0_i32_0 = arith.constant 0 : i32
    %c0_i32_1 = arith.constant 0 : i32
    return %arg0, %c0_i32, %c0_i32_0 : i32, i32, i32
  }
  func.func @transform_2(%arg0: i32) -> (i32, i32, i32) {
    %c0_i32 = arith.constant 0 : i32
    %c0_i32_0 = arith.constant 0 : i32
    %c0_i32_1 = arith.constant 0 : i32
    %c0_i32_2 = arith.constant 0 : i32
    return %c0_i32, %c0_i32_0, %c0_i32_1 : i32, i32, i32
  }
  func.func @transform_3(%arg0: i32) -> (i32, i32, i32) {
    %c0_i32 = arith.constant 0 : i32
    %c0_i32_0 = arith.constant 0 : i32
    %c0_i32_1 = arith.constant 0 : i32
    %c0_i32_2 = arith.constant 0 : i32
    return %c0_i32, %c0_i32_0, %c0_i32_1 : i32, i32, i32
  }
  func.func @transform_4(%arg0: i32) -> (i32, i32, i32) {
    %c0_i32 = arith.constant 0 : i32
    %c0_i32_0 = arith.constant 0 : i32
    %c0_i32_1 = arith.constant 0 : i32
    %c0_i32_2 = arith.constant 0 : i32
    return %c0_i32, %c0_i32_0, %c0_i32_1 : i32, i32, i32
  }
  func.func @transform_5(%arg0: i32) -> (i32, i32) {
    %c0_i32 = arith.constant 0 : i32
    %c0_i32_0 = arith.constant 0 : i32
    %c0_i32_1 = arith.constant 0 : i32
    return %c0_i32, %c0_i32_0 : i32, i32
  }
  func.func @transform_6(%arg0: i32) -> (i32, i32, i32) {
    %c0_i32 = arith.constant 0 : i32
    %c0_i32_0 = arith.constant 0 : i32
    %c0_i32_1 = arith.constant 0 : i32
    return %arg0, %c0_i32, %c0_i32_0 : i32, i32, i32
  }
}

</mosaic_0001>

<bundles_post_ra>
// kernel: node_classification_forward.1
= control target key start
LH: loop header
LB: loop body
LE: loop exit
PB: predicated region body
PF: predicated region fallthrough
CT: control target
= control target key end

     0   :  { %s3038_s21 = smov 0   ;;  %s4063_s0 = inlined_call_operand.vmem [shape: bf16[2,256,256], index: 0, kind: input, shape index: {}]   ;;  %s4064_s1 = inlined_call_operand.vmem [shape: bf16[2,256,128], index: 1, kind: input, shape index: {}]   ;;  %s4065_s2 = inlined_call_operand.vmem [shape: bf16[3,128,128], index: 2, kind: input, shape index: {}]   ;;  %s4066_s3 = inlined_call_operand.vmem [shape: f32[3,1,128], index: 3, kind: input, shape index: {}]   ;;  %s4067_s4 = inlined_call_operand.vmem [shape: bf16[3,128,128], index: 4, kind: input, shape index: {}]   ;;  %s4068_s5 = inlined_call_operand.vmem [shape: f32[1,128], index: 5, kind: input, shape index: {}]   ;;  %s4069_s6 = inlined_call_operand.vmem [shape: f32[2,256,128], index: 6, kind: output, shape index: {}]  }
   0x1 LB: > { %s2421_s22 = sadd.s32 4294967295, %s3001_s21   ;;  %p2425_p0 = scmp.ge.s32.totalorder %s3001_s21, 1  ;;  %s3001_s21 = sphi %s3038_s21, %s16_s21  }
   0x2   : > { %p222_p1 = scmp.lt.s32.totalorder %s3001_s21, 3 }
   0x4   : > { %p223_p2 = pnand %p2425_p0, %p222_p1 }
   0x6   : > { %226 = sbr.rel (%p223_p2) target bundleno = 2087 (0x827), region = 44 }
   0xb   : > { %v2942_v0 = vld [vmem:[%s4065_s2 + $0x38] sm:$0xff]  ;;  %v2941_v1 = vld [vmem:[%s4065_s2 + $0x30] sm:$0xff]  ;;  %v2940_v2 = vld [vmem:[%s4065_s2 + $0x28] sm:$0xff]  ;;  %p257_p3 = scmp.lt.s32.totalorder %s2421_s22, 1 }
   0xc   : > { %496 = vmatpush.bf16.msra.mxu0 %v2942_v0  ;;  %v2939_v3 = vld [vmem:[%s4065_s2 + $0x20] sm:$0xff]  ;;  %v2938_v4 = vld [vmem:[%s4065_s2 + $0x18] sm:$0xff]  ;;  %v2937_v5 = vld [vmem:[%s4065_s2 + $0x10] sm:$0xff] }
   0xd   : > { %s4179_s22 = smov (!%p257_p3, %s2421_s22), 1  ;;  %v2936_v6 = vld [vmem:[%s4065_s2 + $0x8] sm:$0xff]  ;;  %v2935_v7 = vld [vmem:[%s4065_s2] sm:$0xff] }
   0xe   : > { %s2885_s13 = sshll.u32 %s4179_s22, 7  ;;  %s2884_s19 = sshll.u32 %s4179_s22, 8 }
   0xf   : > { %s3076_s18 = scalar_lea.vmem %s4064_s1, %s2885_s13  ;;  %s3100_s24 = scalar_lea.vmem %s4063_s0, %s2884_s19 }
  0x10   : > { %497 = vmatpush.bf16.msra.mxu0 %v2941_v1  ;;  %v2919_v8 = vld [vmem:[%s3076_s18] sm:$0xff]  ;;  %v2920_v9 = vld [vmem:[%s3076_s18 + $0x8] sm:$0xff]  ;;  %v2921_v10 = vld [vmem:[%s3076_s18 + $0x10] sm:$0xff]  ;;  %s3919_s7 = scalar_lea.vmem %s4069_s6, %s2884_s19 }
  0x11   : > { %v2922_v11 = vld [vmem:[%s3076_s18 + $0x18] sm:$0xff]  ;;  %v2923_v12 = vld [vmem:[%s3076_s18 + $0x20] sm:$0xff]  ;;  %v2924_v13 = vld [vmem:[%s3076_s18 + $0x28] sm:$0xff] }
  0x12   : > { %v2925_v14 = vld [vmem:[%s3076_s18 + $0x30] sm:$0xff]  ;;  %v2926_v15 = vld [vmem:[%s3076_s18 + $0x38] sm:$0xff]  ;;  %v2927_v16 = vld [vmem:[%s3076_s18 + $0x40] sm:$0xff] }
  0x13   : > { %v2928_v20 = vld [vmem:[%s3076_s18 + $0x48] sm:$0xff]  ;;  %v2929_v24 = vld [vmem:[%s3076_s18 + $0x50] sm:$0xff]  ;;  %v2930_v28 = vld [vmem:[%s3076_s18 + $0x58] sm:$0xff] }
  0x14   : > { %498 = vmatpush.bf16.msra.mxu0 %v2940_v2  ;;  %v2931_v32 = vld [vmem:[%s3076_s18 + $0x60] sm:$0xff]  ;;  %v2932_v35 = vld [vmem:[%s3076_s18 + $0x68] sm:$0xff]  ;;  %v2933_v38 = vld [vmem:[%s3076_s18 + $0x70] sm:$0xff] }
  0x15   : > { %v2934_v41 = vld [vmem:[%s3076_s18 + $0x78] sm:$0xff]  ;;  %v2530_v63 = vld [vmem:[%s3100_s24] sm:$0xf]  ;;  %v2888_v0 = vld [vmem:[%s3100_s24 + $0x4] sm:$0xf0] }
  0x16   : > { %v3104_v1 = vor.u32 %v2888_v0, %v2530_v63  ;;  %v2953_v63 = vld [vmem:[%s4065_s2 + $0x50] sm:$0xff] }
  0x17   : > { %v2901_v0 = vld [vmem:[%s3100_s24 + $0x74] sm:$0xf] }
  0x18   : > { %499 = vmatpush.bf16.msra.mxu0 %v2939_v3 }
  0x1c   : > { %500 = vmatpush.bf16.msra.mxu0 %v2938_v4 }
  0x20   : > { %501 = vmatpush.bf16.msra.mxu0 %v2937_v5  ;;  %v2538_v5 = vld [vmem:[%s3100_s24 + $0x10] sm:$0xf] }
  0x24   : > { %502 = vmatpush.bf16.msra.mxu0 %v2936_v6  ;;  %v2890_v6 = vld [vmem:[%s3100_s24 + $0x14] sm:$0xf0] }
  0x28   : > { %503 = vmatpush.bf16.msra.mxu0 %v2935_v7 }
  0x2b   : > { %504 = vmatmul.bf16.vlgmr.msra.gmra.mxu0 %v2919_v8  ;;  %v3109_v8 = vor.u32 %v2890_v6, %v2538_v5  ;;  %v2602_v5 = vld [vmem:[%s3100_s24 + $0x90] sm:$0xf]  ;;  %v2906_v6 = vld [vmem:[%s3100_s24 + $0x94] sm:$0xf0] }
  0x3b   : > { %509 = vmatmul.bf16.gmra.mxu0 %v2920_v9 }
  0x4b   : > { %514 = vmatmul.bf16.gmra.mxu0 %v2921_v10 }
  0x5b   : > { %519 = vmatmul.bf16.gmra.mxu0 %v2922_v11 }
  0x6b   : > { %524 = vmatmul.bf16.gmra.mxu0 %v2923_v12  ;;  %v2546_v12 = vld [vmem:[%s3100_s24 + $0x20] sm:$0xf] }
  0x7b   : > { %529 = vmatmul.bf16.gmra.mxu0 %v2924_v13  ;;  %v2892_v13 = vld [vmem:[%s3100_s24 + $0x24] sm:$0xf0] }
  0x8b   : > { %534 = vmatmul.bf16.gmra.mxu0 %v2925_v14 }
  0x9b   : > { %539 = vmatmul.bf16.gmra.mxu0 %v2926_v15  ;;  %v3114_v15 = vor.u32 %v2892_v13, %v2546_v12  ;;  %v2903_v12 = vld [vmem:[%s3100_s24 + $0x84] sm:$0xf]  ;;  %v2596_v13 = vld [vmem:[%s3100_s24 + $0x88] sm:$0xf0] }
  0xa8   : > { %v505_v17 = vpop.f32.mrf.mxu0 }
  0xab   : > { %544 = vmatmul.bf16.gmra.mxu0 %v2927_v16  ;;  %v2887_v16 = vld [vmem:[%s3100_s24 + $0x4] sm:$0xf] }
  0xb0   : > { %v507_v18 = vpop.f32.mrf.mxu0 }
  0xb1   : > { %v585_v19 = vpack.c.bf16 %v507_v18, %v505_v17  ;;  %v2532_v17 = vld [vmem:[%s3100_s24 + $0x8] sm:$0xf0] }
  0xb8   : > { %v510_v21 = vpop.f32.mrf.mxu0 }
  0xbb   : > { %549 = vmatmul.bf16.gmra.mxu0 %v2928_v20  ;;  %v2554_v20 = vld [vmem:[%s3100_s24 + $0x30] sm:$0xf] }
  0xc0   : > { %v512_v22 = vpop.f32.mrf.mxu0 }
  0xc1   : > { %v586_v23 = vpack.c.bf16 %v512_v22, %v510_v21  ;;  %v2894_v21 = vld [vmem:[%s3100_s24 + $0x34] sm:$0xf0] }
  0xc2   : > { %v3124_v22 = vor.u32 %v2894_v21, %v2554_v20  ;;  %v3222_v20 = vor.u32 %v2903_v12, %v2596_v13  ;;  %v2620_v12 = vld [vmem:[%s3100_s24 + $0xb8] sm:$0xf0] }
  0xc4   : > { %4098 = vst [vmem:[#allocation4_spill] sm:$0xff] %v3222_v20 }
  0xc8   : > { %v515_v25 = vpop.f32.mrf.mxu0 }
  0xcb   : > { %554 = vmatmul.bf16.gmra.mxu0 %v2929_v24  ;;  %v2540_v24 = vld [vmem:[%s3100_s24 + $0x18] sm:$0xf0] }
  0xd0   : > { %v517_v26 = vpop.f32.mrf.mxu0 }
  0xd1   : > { %v587_v27 = vpack.c.bf16 %v517_v26, %v515_v25  ;;  %v2562_v26 = vld [vmem:[%s3100_s24 + $0x40] sm:$0xf] }
  0xd8   : > { %v520_v29 = vpop.f32.mrf.mxu0 }
  0xdb   : > { %559 = vmatmul.bf16.gmra.mxu0 %v2930_v28 }
  0xe0   : > { %v522_v30 = vpop.f32.mrf.mxu0 }
  0xe1   : > { %v588_v31 = vpack.c.bf16 %v522_v30, %v520_v29  ;;  %v2891_v29 = vld [vmem:[%s3100_s24 + $0x24] sm:$0xf]  ;;  %v2548_v30 = vld [vmem:[%s3100_s24 + $0x28] sm:$0xf0] }
  0xe8   : > { %v525_v33 = vpop.f32.mrf.mxu0 }
  0xeb   : > { %564 = vmatmul.bf16.gmra.mxu0 %v2931_v32  ;;  %v2570_v32 = vld [vmem:[%s3100_s24 + $0x50] sm:$0xf] }
  0xf0   : > { %v527_v34 = vpop.f32.mrf.mxu0 }
  0xf1   : > { %v589_v48 = vpack.c.bf16 %v527_v34, %v525_v33  ;;  %v2898_v33 = vld [vmem:[%s3100_s24 + $0x54] sm:$0xf0] }
  0xf2   : > { %v3144_v34 = vor.u32 %v2898_v33, %v2570_v32  ;;  %v2618_v32 = vld [vmem:[%s3100_s24 + $0xb0] sm:$0xf]  ;;  %v2910_v33 = vld [vmem:[%s3100_s24 + $0xb4] sm:$0xf0] }
  0xf8   : > { %v530_v36 = vpop.f32.mrf.mxu0 }
  0xfb   : > { %569 = vmatmul.bf16.gmra.mxu0 %v2932_v35  ;;  %v2893_v35 = vld [vmem:[%s3100_s24 + $0x34] sm:$0xf] }
 0x100   : > { %v532_v37 = vpop.f32.mrf.mxu0 }
 0x101   : > { %v590_v47 = vpack.c.bf16 %v532_v37, %v530_v36  ;;  %v2556_v36 = vld [vmem:[%s3100_s24 + $0x38] sm:$0xf0] }
 0x102   : > { %v3148_v37 = vor.u32 %v2893_v35, %v2556_v36 }
 0x108   : > { %v535_v39 = vpop.f32.mrf.mxu0 }
 0x10b   : > { %574 = vmatmul.bf16.gmra.mxu0 %v2933_v38  ;;  %v2578_v38 = vld [vmem:[%s3100_s24 + $0x60] sm:$0xf] }
 0x110   : > { %v537_v40 = vpop.f32.mrf.mxu0 }
 0x111   : > { %v591_v45 = vpack.c.bf16 %v537_v40, %v535_v39  ;;  %v2900_v39 = vld [vmem:[%s3100_s24 + $0x64] sm:$0xf0] }
 0x112   : > { %v3154_v40 = vor.u32 %v2900_v39, %v2578_v38  ;;  %v3237_v38 = vor.u32 %v2910_v33, %v2618_v32 }
 0x118   : > { %v540_v42 = vpop.f32.mrf.mxu0 }
 0x11b   : > { %579 = vmatmul.bf16.gmra.mxu0 %v2934_v41  ;;  %v2895_v41 = vld [vmem:[%s3100_s24 + $0x44] sm:$0xf] }
 0x120   : > { %v542_v43 = vpop.f32.mrf.mxu0 }
 0x121   : > { %v592_v44 = vpack.c.bf16 %v542_v43, %v540_v42  ;;  %v2564_v42 = vld [vmem:[%s3100_s24 + $0x48] sm:$0xf0] }
 0x122   : > { %v3158_v43 = vor.u32 %v2895_v41, %v2564_v42 }
 0x123   : > { %765 = vmatpush.bf16.msra.mxu1 %v592_v44  ;;  %v2586_v44 = vld [vmem:[%s3100_s24 + $0x70] sm:$0xf] }
 0x127   : > { %766 = vmatpush.bf16.msra.mxu1 %v591_v45  ;;  %v2902_v45 = vld [vmem:[%s3100_s24 + $0x74] sm:$0xf0] }
 0x128   : > { %v545_v46 = vpop.f32.mrf.mxu0 }
 0x12b   : > { %767 = vmatpush.bf16.msra.mxu1 %v590_v47  ;;  %v2897_v47 = vld [vmem:[%s3100_s24 + $0x54] sm:$0xf] }
 0x12f   : > { %768 = vmatpush.bf16.msra.mxu1 %v589_v48  ;;  %v2572_v48 = vld [vmem:[%s3100_s24 + $0x58] sm:$0xf0] }
 0x130   : > { %v547_v49 = vpop.f32.mrf.mxu0 }
 0x131   : > { %v593_v18 = vpack.c.bf16 %v547_v49, %v545_v46  ;;  %v3164_v46 = vor.u32 %v2902_v45, %v2586_v44  ;;  %v3168_v49 = vor.u32 %v2897_v47, %v2572_v48 }
 0x133   : > { %769 = vmatpush.bf16.msra.mxu1 %v588_v31  ;;  %v3138_v31 = vor.u32 %v2891_v29, %v2548_v30  ;;  %v2604_v29 = vld [vmem:[%s3100_s24 + $0x98] sm:$0xf0] }
 0x137   : > { %770 = vmatpush.bf16.msra.mxu1 %v587_v27  ;;  %v2896_v27 = vld [vmem:[%s3100_s24 + $0x44] sm:$0xf0] }
 0x138   : > { %v550_v50 = vpop.f32.mrf.mxu0  ;;  %v3134_v28 = vor.u32 %v2896_v27, %v2562_v26  ;;  %v2905_v27 = vld [vmem:[%s3100_s24 + $0x94] sm:$0xf] }
 0x139   : > { %v3239_v42 = vor.u32 %v2905_v27, %v2604_v29 }
 0x13b   : > { %771 = vmatpush.bf16.msra.mxu1 %v586_v23  ;;  %v2889_v23 = vld [vmem:[%s3100_s24 + $0x14] sm:$0xf]  ;;  %4099 = vst [vmem:[#allocation5_spill] sm:$0xff] %v3239_v42 }
 0x13c   : > { %v3128_v25 = vor.u32 %v2889_v23, %v2540_v24  ;;  %v3229_v23 = vld [vmem:[%s4066_s3] ss:$0 sm:$0xff] }
 0x13f   : > { %772 = vmatpush.bf16.msra.mxu1 %v585_v19  ;;  %v3118_v19 = vor.u32 %v2887_v16, %v2532_v17  ;;  %v2610_v16 = vld [vmem:[%s3100_s24 + $0xa0] sm:$0xf]  ;;  %v2908_v17 = vld [vmem:[%s3100_s24 + $0xa4] sm:$0xf0] }
 0x140   : > { %v552_v51 = vpop.f32.mrf.mxu0 }
 0x141   : > { %v594_v14 = vpack.c.bf16 %v552_v51, %v550_v50  ;;  %v2958_v50 = vld [vmem:[%s4065_s2 + $0x78] sm:$0xff]  ;;  %v2957_v51 = vld [vmem:[%s4065_s2 + $0x70] sm:$0xff] }
 0x142   : > { %773 = vmatmul.bf16.vlgmr.msra.gmra.mxu1 %v3104_v1  ;;  %1072 = vmatpush.bf16.msra.mxu3 %v2958_v50 }
 0x146   : > { %1073 = vmatpush.bf16.msra.mxu3 %v2957_v51 }
 0x148   : > { %v555_v52 = vpop.f32.mrf.mxu0 }
 0x150   : > { %v557_v53 = vpop.f32.mrf.mxu0 }
 0x151   : > { %v595_v11 = vpack.c.bf16 %v557_v53, %v555_v52  ;;  %v2594_v52 = vld [vmem:[%s3100_s24 + $0x80] sm:$0xf]  ;;  %v2904_v53 = vld [vmem:[%s3100_s24 + $0x84] sm:$0xf0] }
 0x152   : > { %778 = vmatmul.bf16.gmra.mxu1 %v3109_v8 }
 0x158   : > { %v560_v54 = vpop.f32.mrf.mxu0 }
 0x160   : > { %v562_v55 = vpop.f32.mrf.mxu0 }
 0x161   : > { %v596_v10 = vpack.c.bf16 %v562_v55, %v560_v54  ;;  %v2956_v54 = vld [vmem:[%s4065_s2 + $0x68] sm:$0xff]  ;;  %v3183_v55 = vor.u32 %v2904_v53, %v2594_v52  ;;  %v2907_v52 = vld [vmem:[%s3100_s24 + $0xa4] sm:$0xf] }
 0x162   : > { %783 = vmatmul.bf16.gmra.mxu1 %v3114_v15  ;;  %1074 = vmatpush.bf16.msra.mxu3 %v2956_v54  ;;  %v2612_v53 = vld [vmem:[%s3100_s24 + $0xa8] sm:$0xf0] }
 0x168   : > { %v565_v56 = vpop.f32.mrf.mxu0 }
 0x170   : > { %v567_v57 = vpop.f32.mrf.mxu0 }
 0x171   : > { %v597_v9 = vpack.c.bf16 %v567_v57, %v565_v56  ;;  %v2899_v56 = vld [vmem:[%s3100_s24 + $0x64] sm:$0xf]  ;;  %v2580_v57 = vld [vmem:[%s3100_s24 + $0x68] sm:$0xf0] }
 0x172   : > { %788 = vmatmul.bf16.gmra.mxu1 %v3124_v22 }
 0x178   : > { %v570_v58 = vpop.f32.mrf.mxu0 }
 0x180   : > { %v572_v59 = vpop.f32.mrf.mxu0 }
 0x181   : > { %v598_v7 = vpack.c.bf16 %v572_v59, %v570_v58  ;;  %v2955_v59 = vld [vmem:[%s4065_s2 + $0x60] sm:$0xff] }
 0x182   : > { %793 = vmatmul.bf16.gmra.mxu1 %v3134_v28  ;;  %1075 = vmatpush.bf16.msra.mxu3 %v2955_v59 }
 0x188   : > { %v575_v60 = vpop.f32.mrf.mxu0 }
 0x190   : > { %v577_v61 = vpop.f32.mrf.mxu0 }
 0x191   : > { %v599_v4 = vpack.c.bf16 %v577_v61, %v575_v60  ;;  %v3190_v60 = vor.u32 %v2899_v56, %v2580_v57  ;;  %v2626_v56 = vld [vmem:[%s3100_s24 + $0xc0] sm:$0xf]  ;;  %v2912_v57 = vld [vmem:[%s3100_s24 + $0xc4] sm:$0xf0] }
 0x192   : > { %798 = vmatmul.bf16.gmra.mxu1 %v3144_v34 }
 0x193   : > { %4096 = vst [vmem:[#allocation2_spill] sm:$0xff] %v3190_v60 }
 0x198   : > { %v580_v62 = vpop.f32.mrf.mxu0 }
 0x1a0   : > { %v582_v2 = vpop.f32.mrf.mxu0 }
 0x1a1   : > { %v600_v3 = vpack.c.bf16 %v582_v2, %v580_v62  ;;  %v2954_v62 = vld [vmem:[%s4065_s2 + $0x58] sm:$0xff] }
 0x1a2   : > { %803 = vmatmul.bf16.gmra.mxu1 %v3154_v40  ;;  %1076 = vmatpush.bf16.msra.mxu3 %v2954_v62  ;;  %v2588_v2 = vld [vmem:[%s3100_s24 + $0x78] sm:$0xf0] }
 0x1a3   : > { %854 = vmatpush.bf16.msra.mxu2 %v600_v3 }
 0x1a6   : > { %1077 = vmatpush.bf16.msra.mxu3 %v2953_v63 }
 0x1a7   : > { %855 = vmatpush.bf16.msra.mxu2 %v599_v4  ;;  %v2952_v4 = vld [vmem:[%s4065_s2 + $0x48] sm:$0xff] }
 0x1aa   : > { %1078 = vmatpush.bf16.msra.mxu3 %v2952_v4 }
 0x1ab   : > { %856 = vmatpush.bf16.msra.mxu2 %v598_v7  ;;  %v3207_v7 = vor.u32 %v2906_v6, %v2602_v5 }
 0x1af   : > { %857 = vmatpush.bf16.msra.mxu2 %v597_v9  ;;  %v3209_v9 = vor.u32 %v2901_v0, %v2588_v2  ;;  %v3254_v0 = vor.u32 %v2907_v52, %v2612_v53  ;;  %v2916_v52 = vld [vmem:[%s3100_s24 + $0xe4] sm:$0xf0] }
 0x1b1   : > { %4097 = vst [vmem:[#allocation3_spill] sm:$0xff] %v3209_v9 }
 0x1b2   : > { %808 = vmatmul.bf16.gmra.mxu1 %v3164_v46  ;;  %4100 = vst [vmem:[#allocation6_spill] sm:$0xff] %v3254_v0 }
 0x1b3   : > { %858 = vmatpush.bf16.msra.mxu2 %v596_v10  ;;  %v2951_v10 = vld [vmem:[%s4065_s2 + $0x40] sm:$0xff] }
 0x1b4   : > { %1079 = vmatpush.bf16.msra.mxu3 %v2951_v10 }
 0x1b7   : > { %859 = vmatpush.bf16.msra.mxu2 %v595_v11 }
 0x1bb   : > { %860 = vmatpush.bf16.msra.mxu2 %v594_v14 }
 0x1bf   : > { %861 = vmatpush.bf16.msra.mxu2 %v593_v18  ;;  %v774_v58 = vpop.f32.mrf.mxu1  ;;  %v3220_v18 = vor.u32 %v2908_v17, %v2610_v16  ;;  %v2634_v16 = vld [vmem:[%s3100_s24 + $0xd0] sm:$0xf]  ;;  %v2914_v17 = vld [vmem:[%s3100_s24 + $0xd4] sm:$0xf0] }
 0x1c0   : > { %v775_v26 = vadd.f32 %v3229_v23, %v774_v58  ;;  %v3267_v27 = vor.u32 %v2914_v17, %v2634_v16  ;;  %v2918_v16 = vld [vmem:[%s3100_s24 + $0xf4] sm:$0xf0] }
 0x1c2   : > { %862 = vmatmul.bf16.vlgmr.msra.gmra.mxu2 %v3118_v19  ;;  %813 = vmatmul.bf16.gmra.mxu1 %v3183_v55  ;;  %4101 = vst [vmem:[#allocation7_spill] sm:$0xff] %v3267_v27 }
 0x1c7   : > { %v776_v61 = vpop.f32.mrf.mxu1 }
 0x1c8   : > { %v777_v35 = vadd.f32 %v3229_v23, %v776_v61  ;;  %v3252_v61 = vor.u32 %v2912_v57, %v2626_v56 }
 0x1cf   : > { %v779_v3 = vpop.f32.mrf.mxu1 }
 0x1d0   : > { %v780_v51 = vadd.f32 %v3229_v23, %v779_v3 }
 0x1d2   : > { %867 = vmatmul.bf16.gmra.mxu2 %v3128_v25  ;;  %818 = vmatmul.bf16.gmra.mxu1 %v3207_v7 }
 0x1d7   : > { %v781_v11 = vpop.f32.mrf.mxu1 }
 0x1d8   : > { %v782_v58 = vadd.f32 %v3229_v23, %v781_v11  ;;  %v2909_v11 = vld [vmem:[%s3100_s24 + $0xb4] sm:$0xf] }
 0x1d9   : > { %v3269_v33 = vor.u32 %v2909_v11, %v2620_v12  ;;  %v2636_v11 = vld [vmem:[%s3100_s24 + $0xd8] sm:$0xf0]  ;;  %v2650_v12 = vld [vmem:[%s3100_s24 + $0xf0] sm:$0xf] }
 0x1db   : > { %4102 = vst [vmem:[#allocation8_spill] sm:$0xff] %v3269_v33 }
 0x1df   : > { %v784_v14 = vpop.f32.mrf.mxu1 }
 0x1e0   : > { %v785_v10 = vadd.f32 %v3229_v23, %v784_v14 }
 0x1e2   : > { %872 = vmatmul.bf16.gmra.mxu2 %v3138_v31  ;;  %823 = vmatmul.bf16.gmra.mxu1 %v3220_v18 }
 0x1e7   : > { %v786_v21 = vpop.f32.mrf.mxu1 }
 0x1ef   : > { %v789_v30 = vpop.f32.mrf.mxu1 }
 0x1f2   : > { %877 = vmatmul.bf16.gmra.mxu2 %v3148_v37  ;;  %828 = vmatmul.bf16.gmra.mxu1 %v3237_v38 }
 0x1f7   : > { %v791_v48 = vpop.f32.mrf.mxu1 }
 0x1f8   : > { %v792_v53 = vadd.f32 %v3229_v23, %v791_v48 }
 0x1ff   : > { %v794_v54 = vpop.f32.mrf.mxu1 }
 0x202   : > { %882 = vmatmul.bf16.gmra.mxu2 %v3158_v43  ;;  %833 = vmatmul.bf16.gmra.mxu1 %v3252_v61 }
 0x207   : > { %v796_v5 = vpop.f32.mrf.mxu1 }
 0x208   : > { %v797_v17 = vadd.f32 %v3229_v23, %v796_v5 }
 0x20f   : > { %v799_v13 = vpop.f32.mrf.mxu1 }
 0x212   : > { %887 = vmatmul.bf16.gmra.mxu2 %v3168_v49  ;;  %838 = vmatmul.bf16.gmra.mxu1 %v3267_v27 }
 0x222   : > { %892 = vmatmul.bf16.gmra.mxu2 %v3190_v60 }
 0x232   : > { %897 = vmatmul.bf16.gmra.mxu2 %v3209_v9 }
 0x242   : > { %902 = vmatmul.bf16.gmra.mxu2 %v3222_v20 }
 0x245   : > { %v863_v24 = vpop.f32.mrf.mxu2 }
 0x246   : > { %v864_v36 = vadd.f32 %v863_v24, %v775_v26  ;;  %v787_v24 = vadd.f32 %v3229_v23, %v786_v21 }
 0x248   : > { %v943_v44 = vmax.f32 %v864_v36, 0.0 }
 0x24d   : > { %v865_v39 = vpop.f32.mrf.mxu2 }
 0x24e   : > { %v866_v41 = vadd.f32 %v865_v39, %v777_v35  ;;  %v801_v39 = vpop.f32.mrf.mxu1 }
 0x250   : > { %v944_v45 = vmax.f32 %v866_v41, 0.0  ;;  %v790_v41 = vadd.f32 %v3229_v23, %v789_v30 }
 0x252   : > { %907 = vmatmul.bf16.gmra.mxu2 %v3239_v42  ;;  %v3243_v47 = vpack.c.bf16 %v944_v45, %v943_v44  ;;  %v2911_v44 = vld [vmem:[%s3100_s24 + $0xc4] sm:$0xf]  ;;  %v2628_v45 = vld [vmem:[%s3100_s24 + $0xc8] sm:$0xf0] }
 0x253   : > { %v2943_v42 = vld [vmem:[%s4067_s4] sm:$0xff] }
 0x254   : > { %1080 = vmatmul.bf16.vlgmr.msra.gmra.mxu3 %v3243_v47 }
 0x255   : > { %v868_v50 = vpop.f32.mrf.mxu2 }
 0x256   : > { %v869_v59 = vadd.f32 %v868_v50, %v780_v51  ;;  %v804_v50 = vpop.f32.mrf.mxu1  ;;  %v2642_v51 = vld [vmem:[%s3100_s24 + $0xe0] sm:$0xf] }
 0x257   : > { %v3282_v57 = vor.u32 %v2916_v52, %v2642_v51  ;;  %v2915_v51 = vld [vmem:[%s3100_s24 + $0xe4] sm:$0xf]  ;;  %v2644_v52 = vld [vmem:[%s3100_s24 + $0xe8] sm:$0xf0] }
 0x258   : > { %v945_v2 = vmax.f32 %v869_v59, 0.0 }
 0x259   : > { %4103 = vst [vmem:[#allocation9_spill] sm:$0xff] %v3282_v57  ;;  %843 = vmatmul.bf16.gmra.mxu1 %v3282_v57 }
 0x25d   : > { %v870_v62 = vpop.f32.mrf.mxu2 }
 0x25e   : > { %v871_v63 = vadd.f32 %v870_v62, %v782_v58  ;;  %v3284_v62 = vor.u32 %v2911_v44, %v2628_v45  ;;  %v800_v44 = vadd.f32 %v3229_v23, %v799_v13 }
 0x260   : > { %v946_v3 = vmax.f32 %v871_v63, 0.0  ;;  %4104 = vst [vmem:[#allocation10_spill] sm:$0xff] %v3284_v62 }
 0x262   : > { %912 = vmatmul.bf16.gmra.mxu2 %v3254_v0  ;;  %v3258_v4 = vpack.c.bf16 %v946_v3, %v945_v2  ;;  %v806_v3 = vpop.f32.mrf.mxu1 }
 0x264   : > { %1085 = vmatmul.bf16.gmra.mxu3 %v3258_v4 }
 0x265   : > { %v873_v6 = vpop.f32.mrf.mxu2 }
 0x266   : > { %v874_v26 = vadd.f32 %v873_v6, %v785_v10  ;;  %v795_v6 = vadd.f32 %v3229_v23, %v794_v54  ;;  %v2913_v10 = vld [vmem:[%s3100_s24 + $0xd4] sm:$0xf] }
 0x268   : > { %v947_v14 = vmax.f32 %v874_v26, 0.0  ;;  %v3297_v26 = vor.u32 %v2918_v16, %v2650_v12  ;;  %v2917_v12 = vld [vmem:[%s3100_s24 + $0xf4] sm:$0xf]  ;;  %v2652_v16 = vld [vmem:[%s3100_s24 + $0xf8] sm:$0xf0] }
 0x26a   : > { %4105 = vst [vmem:[#allocation11_spill] sm:$0xff] %v3297_v26  ;;  %848 = vmatmul.bf16.gmra.mxu1 %v3297_v26 }
 0x26d   : > { %v875_v29 = vpop.f32.mrf.mxu2 }
 0x26e   : > { %v876_v32 = vadd.f32 %v875_v29, %v787_v24 }
 0x270   : > { %v948_v35 = vmax.f32 %v876_v32, 0.0 }
 0x272   : > { %917 = vmatmul.bf16.gmra.mxu2 %v3269_v33  ;;  %v3273_v36 = vpack.c.bf16 %v948_v35, %v947_v14  ;;  %v3299_v14 = vor.u32 %v2913_v10, %v2636_v11  ;;  %v809_v35 = vpop.f32.mrf.mxu1  ;;  %v805_v11 = vadd.f32 %v3229_v23, %v804_v50 }
 0x274   : > { %1090 = vmatmul.bf16.gmra.mxu3 %v3273_v36  ;;  %4106 = vst [vmem:[#allocation12_spill] sm:$0xff] %v3299_v14 }
 0x275   : > { %v878_v21 = vpop.f32.mrf.mxu2 }
 0x276   : > { %v879_v56 = vadd.f32 %v878_v21, %v790_v41 }
 0x278   : > { %v949_v30 = vmax.f32 %v879_v56, 0.0 }
 0x27a   : > { %v811_v45 = vpop.f32.mrf.mxu1 }
 0x27d   : > { %v880_v58 = vpop.f32.mrf.mxu2 }
 0x27e   : > { %v881_v59 = vadd.f32 %v880_v58, %v792_v53  ;;  %v802_v53 = vadd.f32 %v3229_v23, %v801_v39  ;;  %v807_v39 = vadd.f32 %v3229_v23, %v806_v3  ;;  %v812_v3 = vadd.f32 %v3229_v23, %v811_v45 }
 0x280   : > { %v950_v63 = vmax.f32 %v881_v59, 0.0 }
 0x282   : > { %922 = vmatmul.bf16.gmra.mxu2 %v3284_v62  ;;  %v3288_v2 = vpack.c.bf16 %v950_v63, %v949_v30  ;;  %v3310_v30 = vor.u32 %v2915_v51, %v2644_v52  ;;  %v814_v10 = vpop.f32.mrf.mxu1  ;;  %v810_v52 = vadd.f32 %v3229_v23, %v809_v35  ;;  %v2950_v62 = vld [vmem:[%s4067_s4 + $0x38] sm:$0xff] }
 0x283   : > { %1610 = vmatpush.bf16.msrb.mxu3 %v2950_v62 }
 0x284   : > { %1095 = vmatmul.bf16.gmra.mxu3 %v3288_v2  ;;  %4107 = vst [vmem:[#allocation13_spill] sm:$0xff] %v3310_v30 }
 0x285   : > { %v883_v48 = vpop.f32.mrf.mxu2 }
 0x286   : > { %v884_v24 = vadd.f32 %v883_v48, %v795_v6 }
 0x288   : > { %v951_v21 = vmax.f32 %v884_v24, 0.0 }
 0x28d   : > { %v885_v29 = vpop.f32.mrf.mxu2 }
 0x28e   : > { %v886_v32 = vadd.f32 %v885_v29, %v797_v17  ;;  %v816_v29 = vpop.f32.mrf.mxu1 }
 0x290   : > { %v952_v54 = vmax.f32 %v886_v32, 0.0 }
 0x292   : > { %927 = vmatmul.bf16.gmra.mxu2 %v3299_v14  ;;  %v3303_v41 = vpack.c.bf16 %v952_v54, %v951_v21  ;;  %v3320_v21 = vor.u32 %v2917_v12, %v2652_v16  ;;  %v815_v12 = vadd.f32 %v3229_v23, %v814_v10 }
 0x294   : > { %1100 = vmatmul.bf16.gmra.mxu3 %v3303_v41  ;;  %4108 = vst [vmem:[#allocation14_spill] sm:$0xff] %v3320_v21 }
 0x295   : > { %v888_v5 = vpop.f32.mrf.mxu2 }
 0x296   : > { %v889_v56 = vadd.f32 %v888_v5, %v800_v44  ;;  %v819_v50 = vpop.f32.mrf.mxu1 }
 0x298   : > { %v953_v63 = vmax.f32 %v889_v56, 0.0 }
 0x29d   : > { %v890_v58 = vpop.f32.mrf.mxu2 }
 0x29e   : > { %v891_v59 = vadd.f32 %v890_v58, %v802_v53 }
 0x2a0   : > { %v954_v48 = vmax.f32 %v891_v59, 0.0 }
 0x2a2   : > { %932 = vmatmul.bf16.gmra.mxu2 %v3310_v30  ;;  %v3313_v6 = vpack.c.bf16 %v954_v48, %v953_v63  ;;  %v821_v48 = vpop.f32.mrf.mxu1 }
 0x2a3   : > { %v822_v10 = vadd.f32 %v3229_v23, %v821_v48 }
 0x2a4   : > { %1105 = vmatmul.bf16.gmra.mxu3 %v3313_v6 }
 0x2a5   : > { %v893_v13 = vpop.f32.mrf.mxu2 }
 0x2a6   : > { %v894_v17 = vadd.f32 %v893_v13, %v805_v11 }
 0x2a8   : > { %v955_v54 = vmax.f32 %v894_v17, 0.0 }
 0x2aa   : > { %v824_v16 = vpop.f32.mrf.mxu1 }
 0x2ad   : > { %v895_v24 = vpop.f32.mrf.mxu2 }
 0x2ae   : > { %v896_v32 = vadd.f32 %v895_v24, %v807_v39  ;;  %v817_v39 = vadd.f32 %v3229_v23, %v816_v29 }
 0x2b0   : > { %v956_v5 = vmax.f32 %v896_v32, 0.0 }
 0x2b2   : > { %937 = vmatmul.bf16.gmra.mxu2 %v3320_v21  ;;  %v3323_v44 = vpack.c.bf16 %v956_v5, %v955_v54 }
 0x2b4   : > { %1110 = vmatmul.bf16.gmra.mxu3 %v3323_v44 }
 0x2b5   : > { %v898_v51 = vpop.f32.mrf.mxu2 }
 0x2b6   : > { %v899_v53 = vadd.f32 %v898_v51, %v810_v52  ;;  %v826_v51 = vpop.f32.mrf.mxu1 }
 0x2b8   : > { %v957_v59 = vmax.f32 %v899_v53, 0.0 }
 0x2bd   : > { %v900_v56 = vpop.f32.mrf.mxu2 }
 0x2be   : > { %v901_v58 = vadd.f32 %v900_v56, %v812_v3  ;;  %v820_v3 = vadd.f32 %v3229_v23, %v819_v50  ;;  %v825_v50 = vadd.f32 %v3229_v23, %v824_v16 }
 0x2c0   : > { %v958_v63 = vmax.f32 %v901_v58, 0.0 }
 0x2c2   : > { %v3328_v13 = vpack.c.bf16 %v958_v63, %v957_v59  ;;  %v829_v59 = vpop.f32.mrf.mxu1 }
 0x2c4   : > { %1115 = vmatmul.bf16.gmra.mxu3 %v3328_v13 }
 0x2c5   : > { %v903_v11 = vpop.f32.mrf.mxu2 }
 0x2c6   : > { %v904_v17 = vadd.f32 %v903_v11, %v815_v12 }
 0x2c8   : > { %v959_v45 = vmax.f32 %v904_v17, 0.0 }
 0x2ca   : > { %v831_v48 = vpop.f32.mrf.mxu1 }
 0x2cd   : > { %v905_v35 = vpop.f32.mrf.mxu2 }
 0x2ce   : > { %v906_v24 = vadd.f32 %v905_v35, %v817_v39 }
 0x2d0   : > { %v960_v32 = vmax.f32 %v906_v24, 0.0  ;;  %v827_v24 = vadd.f32 %v3229_v23, %v826_v51  ;;  %v830_v51 = vadd.f32 %v3229_v23, %v829_v59 }
 0x2d2   : > { %v3333_v54 = vpack.c.bf16 %v960_v32, %v959_v45 }
 0x2d4   : > { %1120 = vmatmul.bf16.gmra.mxu3 %v3333_v54 }
 0x2d5   : > { %v908_v5 = vpop.f32.mrf.mxu2 }
 0x2d6   : > { %v909_v53 = vadd.f32 %v908_v5, %v820_v3 }
 0x2d7   : > { %v3336_v52 = vpop.f32.mrf.mxu3 }
 0x2d8   : > { %v961_v63 = vmax.f32 %v909_v53, 0.0 }
 0x2dd   : > { %v910_v56 = vpop.f32.mrf.mxu2 }
 0x2de   : > { %v911_v29 = vadd.f32 %v910_v56, %v822_v10 }
 0x2df   : > { %v3340_v58 = vpop.f32.mrf.mxu3 }
 0x2e0   : > { %v962_v11 = vmax.f32 %v911_v29, 0.0 }
 0x2e2   : > { %v3344_v39 = vpack.c.bf16 %v962_v11, %v961_v63  ;;  %v834_v63 = vpop.f32.mrf.mxu1 }
 0x2e4   : > { %1125 = vmatmul.bf16.gmra.mxu3 %v3344_v39 }
 0x2e5   : > { %v913_v17 = vpop.f32.mrf.mxu2 }
 0x2e6   : > { %v914_v45 = vadd.f32 %v913_v17, %v825_v50  ;;  %v832_v17 = vadd.f32 %v3229_v23, %v831_v48  ;;  %v835_v48 = vadd.f32 %v3229_v23, %v834_v63 }
 0x2e7   : > { %v3347_v35 = vpop.f32.mrf.mxu3 }
 0x2e8   : > { %v963_v10 = vmax.f32 %v914_v45, 0.0 }
 0x2ed   : > { %v915_v32 = vpop.f32.mrf.mxu2 }
 0x2ee   : > { %v916_v5 = vadd.f32 %v915_v32, %v827_v24  ;;  %v836_v32 = vpop.f32.mrf.mxu1 }
 0x2ef   : > { %v3351_v3 = vpop.f32.mrf.mxu3 }
 0x2f0   : > { %v964_v53 = vmax.f32 %v916_v5, 0.0 }
 0x2f2   : > { %v3355_v29 = vpack.c.bf16 %v964_v53, %v963_v10 }
 0x2f4   : > { %1130 = vmatmul.bf16.gmra.mxu3 %v3355_v29 }
 0x2f5   : > { %v918_v11 = vpop.f32.mrf.mxu2 }
 0x2f6   : > { %v919_v50 = vadd.f32 %v918_v11, %v830_v51  ;;  %v839_v59 = vpop.f32.mrf.mxu1  ;;  %v837_v11 = vadd.f32 %v3229_v23, %v836_v32  ;;  %v2949_v32 = vld [vmem:[%s4067_s4 + $0x30] sm:$0xff] }
 0x2f7   : > { %v3358_v16 = vpop.f32.mrf.mxu3  ;;  %1611 = vmatpush.bf16.msrb.mxu3 %v2949_v32  ;;  %v2946_v32 = vld [vmem:[%s4067_s4 + $0x18] sm:$0xff] }
 0x2f8   : > { %v965_v12 = vmax.f32 %v919_v50, 0.0 }
 0x2fd   : > { %v920_v24 = vpop.f32.mrf.mxu2 }
 0x2fe   : > { %v921_v45 = vadd.f32 %v920_v24, %v832_v17 }
 0x2ff   : > { %v3362_v5 = vpop.f32.mrf.mxu3 }
 0x300   : > { %v966_v56 = vmax.f32 %v921_v45, 0.0 }
 0x302   : > { %v3366_v53 = vpack.c.bf16 %v966_v56, %v965_v12  ;;  %v841_v56 = vpop.f32.mrf.mxu1  ;;  %v2947_v12 = vld [vmem:[%s4067_s4 + $0x20] sm:$0xff] }
 0x304   : > { %1135 = vmatmul.bf16.gmra.mxu3 %v3366_v53 }
 0x305   : > { %v923_v21 = vpop.f32.mrf.mxu2 }
 0x306   : > { %v924_v51 = vadd.f32 %v923_v21, %v835_v48  ;;  %v840_v48 = vadd.f32 %v3229_v23, %v839_v59 }
 0x307   : > { %v3369_v30 = vpop.f32.mrf.mxu3 }
 0x308   : > { %v967_v45 = vmax.f32 %v924_v51, 0.0  ;;  %v842_v51 = vadd.f32 %v3229_v23, %v841_v56 }
 0x30d   : > { %v925_v17 = vpop.f32.mrf.mxu2 }
 0x30e   : > { %v926_v24 = vadd.f32 %v925_v17, %v837_v11  ;;  %v844_v11 = vpop.f32.mrf.mxu1 }
 0x30f   : > { %v3373_v50 = vpop.f32.mrf.mxu3 }
 0x310   : > { %v968_v14 = vmax.f32 %v926_v24, 0.0 }
 0x312   : > { %v3377_v10 = vpack.c.bf16 %v968_v14, %v967_v45  ;;  %v2948_v14 = vld [vmem:[%s4067_s4 + $0x28] sm:$0xff] }
 0x313   : > { %1612 = vmatpush.bf16.msrb.mxu3 %v2948_v14  ;;  %v2945_v14 = vld [vmem:[%s4067_s4 + $0x10] sm:$0xff] }
 0x314   : > { %1140 = vmatmul.bf16.gmra.mxu3 %v3377_v10 }
 0x315   : > { %v928_v63 = vpop.f32.mrf.mxu2 }
 0x316   : > { %v929_v17 = vadd.f32 %v928_v63, %v840_v48  ;;  %v846_v56 = vpop.f32.mrf.mxu1 }
 0x317   : > { %v3383_v21 = vpop.f32.mrf.mxu3  ;;  %1613 = vmatpush.bf16.msrb.mxu3 %v2947_v12 }
 0x318   : > { %v969_v33 = vmax.f32 %v929_v17, 0.0 }
 0x31b   : > { %1614 = vmatpush.bf16.msrb.mxu3 %v2946_v32 }
 0x31d   : > { %v930_v24 = vpop.f32.mrf.mxu2 }
 0x31e   : > { %v931_v62 = vadd.f32 %v930_v24, %v842_v51  ;;  %v845_v51 = vadd.f32 %v3229_v23, %v844_v11 }
 0x31f   : > { %v1103_v45 = vpop.f32.mrf.mxu3  ;;  %1615 = vmatpush.bf16.msrb.mxu3 %v2945_v14 }
 0x320   : > { %v970_v0 = vmax.f32 %v931_v62, 0.0  ;;  %v849_v62 = vpop.f32.mrf.mxu1 }
 0x322   : > { %v3396_v59 = vpack.c.bf16 %v970_v0, %v969_v33  ;;  %v2944_v0 = vld [vmem:[%s4067_s4 + $0x8] sm:$0xff]  ;;  %v847_v33 = vadd.f32 %v3229_v23, %v846_v56  ;;  %v850_v56 = vadd.f32 %v3229_v23, %v849_v62 }
 0x323   : > { %1616 = vmatpush.bf16.msrb.mxu3 %v2944_v0 }
 0x324   : > { %1145 = vmatmul.bf16.gmra.mxu3 %v3396_v59 }
 0x325   : > { %v933_v63 = vpop.f32.mrf.mxu2 }
 0x326   : > { %v934_v12 = vadd.f32 %v933_v63, %v845_v51 }
 0x327   : > { %v1106_v48 = vpop.f32.mrf.mxu3  ;;  %1617 = vmatpush.bf16.msrb.mxu3 %v2943_v42 }
 0x328   : > { %v971_v20 = vmax.f32 %v934_v12, 0.0  ;;  %v851_v63 = vpop.f32.mrf.mxu1 }
 0x329   : > { %v852_v51 = vadd.f32 %v3229_v23, %v851_v63 }
 0x32d   : > { %v935_v17 = vpop.f32.mrf.mxu2 }
 0x32e   : > { %v936_v24 = vadd.f32 %v935_v17, %v847_v33 }
 0x32f   : > { %v1108_v32 = vpop.f32.mrf.mxu3 }
 0x330   : > { %v972_v26 = vmax.f32 %v936_v24, 0.0  ;;  %v1166_v23 = vpack.c.bf16 %v1108_v32, %v1106_v48 }
 0x332   : > { %v3413_v11 = vpack.c.bf16 %v972_v26, %v971_v20 }
 0x334   : > { %1150 = vmatmul.bf16.gmra.mxu3 %v3413_v11 }
 0x335   : > { %v938_v14 = vpop.f32.mrf.mxu2 }
 0x336   : > { %v939_v0 = vadd.f32 %v938_v14, %v850_v56  ;;  %v1165_v14 = vpack.c.bf16 %v1103_v45, %v3383_v21 }
 0x337   : > { %v1111_v9 = vpop.f32.mrf.mxu3 }
 0x338   : > { %v973_v60 = vmax.f32 %v939_v0, 0.0 }
 0x33d   : > { %v940_v33 = vpop.f32.mrf.mxu2 }
 0x33e   : > { %v941_v17 = vadd.f32 %v940_v33, %v852_v51 }
 0x33f   : > { %v1113_v57 = vpop.f32.mrf.mxu3 }
 0x340   : > { %v974_v27 = vmax.f32 %v941_v17, 0.0  ;;  %v1167_v24 = vpack.c.bf16 %v1113_v57, %v1111_v9  ;;  %v4112_v57 = vpack.c.bf16 %v3340_v58, %v3336_v52 }
 0x342   : > { %v3418_v12 = vpack.c.bf16 %v974_v27, %v973_v60  ;;  %v4109_v60 = vpack.c.bf16 %v3373_v50, %v3369_v30  ;;  %v4110_v27 = vpack.c.bf16 %v3362_v5, %v3358_v16 }
 0x344   : > { %1155 = vmatmul.bf16.gmra.mxu3 %v3418_v12 }
 0x347   : > { %v1116_v20 = vpop.f32.mrf.mxu3 }
 0x34f   : > { %v1118_v42 = vpop.f32.mrf.mxu3 }
 0x350   : > { %v1168_v26 = vpack.c.bf16 %v1118_v42, %v1116_v20 }
 0x352   : > { %1182 = vmatpush.bf16.msrb.mxu0 %v1168_v26 }
 0x354   : > { %1618 = vmatmul.bf16.vlgmr.msrb.gmra.mxu3 %v3243_v47  ;;  %v4111_v47 = vpack.c.bf16 %v3351_v3, %v3347_v35 }
 0x356   : > { %1183 = vmatpush.bf16.msrb.mxu0 %v1167_v24 }
 0x357   : > { %v1121_v62 = vpop.f32.mrf.mxu3 }
 0x35a   : > { %1184 = vmatpush.bf16.msrb.mxu0 %v1166_v23 }
 0x35e   : > { %1185 = vmatpush.bf16.msrb.mxu0 %v1165_v14 }
 0x35f   : > { %v1123_v56 = vpop.f32.mrf.mxu3 }
 0x360   : > { %v1169_v63 = vpack.c.bf16 %v1123_v56, %v1121_v62 }
 0x362   : > { %1186 = vmatpush.bf16.msrb.mxu0 %v4109_v60 }
 0x364   : > { %1623 = vmatmul.bf16.gmra.mxu3 %v3258_v4 }
 0x366   : > { %1187 = vmatpush.bf16.msrb.mxu0 %v4110_v27 }
 0x367   : > { %v1126_v9 = vpop.f32.mrf.mxu3 }
 0x36a   : > { %1188 = vmatpush.bf16.msrb.mxu0 %v4111_v47  ;;  %v4120_v47 = vld [vmem:[#allocation7_spill] sm:$0xff] }
 0x36e   : > { %1189 = vmatpush.bf16.msrb.mxu0 %v4112_v57  ;;  %v2964_v57 = vld [vmem:[%s4067_s4 + $0x68] sm:$0xff] }
 0x36f   : > { %v1128_v21 = vpop.f32.mrf.mxu3 }
 0x370   : > { %v1170_v45 = vpack.c.bf16 %v1128_v21, %v1126_v9  ;;  %v2973_v9 = vld [vmem:[%s4065_s2 + $0xb0] sm:$0xff]  ;;  %v2972_v21 = vld [vmem:[%s4065_s2 + $0xa8] sm:$0xff] }
 0x371   : > { %1190 = vmatmul.bf16.vlgmr.msrb.gmra.mxu0 %v3104_v1 }
 0x374   : > { %1628 = vmatmul.bf16.gmra.mxu3 %v3273_v36 }
 0x377   : > { %v1131_v4 = vpop.f32.mrf.mxu3 }
 0x37f   : > { %v1133_v30 = vpop.f32.mrf.mxu3 }
 0x380   : > { %v1171_v50 = vpack.c.bf16 %v1133_v30, %v1131_v4  ;;  %v2963_v30 = vld [vmem:[%s4067_s4 + $0x60] sm:$0xff] }
 0x381   : > { %1195 = vmatmul.bf16.gmra.mxu0 %v3109_v8 }
 0x384   : > { %1633 = vmatmul.bf16.gmra.mxu3 %v3288_v2 }
 0x387   : > { %v1136_v16 = vpop.f32.mrf.mxu3 }
 0x38f   : > { %v1138_v35 = vpop.f32.mrf.mxu3 }
 0x390   : > { %v1172_v3 = vpack.c.bf16 %v1138_v35, %v1136_v16  ;;  %v2962_v16 = vld [vmem:[%s4067_s4 + $0x58] sm:$0xff] }
 0x391   : > { %1200 = vmatmul.bf16.gmra.mxu0 %v3114_v15 }
 0x394   : > { %1638 = vmatmul.bf16.gmra.mxu3 %v3303_v41 }
 0x397   : > { %v1141_v52 = vpop.f32.mrf.mxu3 }
 0x39f   : > { %v1143_v58 = vpop.f32.mrf.mxu3 }
 0x3a0   : > { %v1173_v33 = vpack.c.bf16 %v1143_v58, %v1141_v52  ;;  %v2969_v52 = vld [vmem:[%s4065_s2 + $0x90] sm:$0xff]  ;;  %v4122_v58 = vld [vmem:[#allocation2_spill] sm:$0xff] }
 0x3a1   : > { %1205 = vmatmul.bf16.gmra.mxu0 %v3124_v22 }
 0x3a4   : > { %1643 = vmatmul.bf16.gmra.mxu3 %v3313_v6 }
 0x3a7   : > { %v1146_v36 = vpop.f32.mrf.mxu3 }
 0x3af   : > { %v1148_v5 = vpop.f32.mrf.mxu3 }
 0x3b0   : > { %v1174_v0 = vpack.c.bf16 %v1148_v5, %v1146_v36  ;;  %v4123_v36 = vld [vmem:[#allocation9_spill] sm:$0xff]  ;;  %v2960_v5 = vld [vmem:[%s4067_s4 + $0x48] sm:$0xff] }
 0x3b1   : > { %1210 = vmatmul.bf16.gmra.mxu0 %v3134_v28 }
 0x3b4   : > { %1648 = vmatmul.bf16.gmra.mxu3 %v3323_v44 }
 0x3b7   : > { %v1151_v2 = vpop.f32.mrf.mxu3 }
 0x3bf   : > { %v1153_v48 = vpop.f32.mrf.mxu3 }
 0x3c0   : > { %v1175_v6 = vpack.c.bf16 %v1153_v48, %v1151_v2  ;;  %v2968_v2 = vld [vmem:[%s4065_s2 + $0x88] sm:$0xff] }
 0x3c1   : > { %1215 = vmatmul.bf16.gmra.mxu0 %v3144_v34 }
 0x3c4   : > { %1653 = vmatmul.bf16.gmra.mxu3 %v3328_v13 }
 0x3c7   : > { %v1156_v32 = vpop.f32.mrf.mxu3 }
 0x3cf   : > { %v1158_v41 = vpop.f32.mrf.mxu3 }
 0x3d0   : > { %v1176_v51 = vpack.c.bf16 %v1158_v41, %v1156_v32  ;;  %v2959_v32 = vld [vmem:[%s4067_s4 + $0x40] sm:$0xff] }
 0x3d1   : > { %1220 = vmatmul.bf16.gmra.mxu0 %v3154_v40  ;;  %v2967_v41 = vld [vmem:[%s4065_s2 + $0x80] sm:$0xff] }
 0x3d2   : > { %1271 = vmatpush.bf16.msrb.mxu1 %v1176_v51 }
 0x3d4   : > { %1658 = vmatmul.bf16.gmra.mxu3 %v3333_v54 }
 0x3d6   : > { %1272 = vmatpush.bf16.msrb.mxu1 %v1175_v6  ;;  %v4124_v6 = vld [vmem:[#allocation3_spill] sm:$0xff] }
 0x3d7   : > { %v3459_v54 = vpop.f32.mrf.mxu3 }
 0x3d8   : > { %4113 = vst [vmem:[#allocation15_spill] sm:$0xff] %v3459_v54 }
 0x3da   : > { %1273 = vmatpush.bf16.msrb.mxu1 %v1174_v0  ;;  %v4125_v0 = vld [vmem:[#allocation11_spill] sm:$0xff] }
 0x3de   : > { %1274 = vmatpush.bf16.msrb.mxu1 %v1173_v33 }
 0x3df   : > { %v3468_v20 = vpop.f32.mrf.mxu3 }
 0x3e0   : > { %4114 = vst [vmem:[#allocation16_spill] sm:$0xff] %v3468_v20 }
 0x3e1   : > { %1225 = vmatmul.bf16.gmra.mxu0 %v3164_v46 }
 0x3e2   : > { %1275 = vmatpush.bf16.msrb.mxu1 %v1172_v3  ;;  %v2961_v3 = vld [vmem:[%s4067_s4 + $0x50] sm:$0xff] }
 0x3e4   : > { %1663 = vmatmul.bf16.gmra.mxu3 %v3344_v39 }
 0x3e6   : > { %1276 = vmatpush.bf16.msrb.mxu1 %v1171_v50  ;;  %v2971_v50 = vld [vmem:[%s4065_s2 + $0xa0] sm:$0xff] }
 0x3ea   : > { %1277 = vmatpush.bf16.msrb.mxu1 %v1170_v45 }
 0x3ee   : > { %1278 = vmatpush.bf16.msrb.mxu1 %v1169_v63  ;;  %v3452_v44 = vpop.f32.mrf.mxu0  ;;  %v2974_v63 = vld [vmem:[%s4065_s2 + $0xb8] sm:$0xff] }
 0x3ef   : > { %1764 = vmatpush.bf16.msra.mxu0 %v2974_v63 }
 0x3f1   : > { %1279 = vmatmul.bf16.vlgmr.msrb.gmra.mxu1 %v3118_v19  ;;  %1230 = vmatmul.bf16.gmra.mxu0 %v3183_v55 }
 0x3f3   : > { %1765 = vmatpush.bf16.msra.mxu0 %v2973_v9  ;;  %v4126_v9 = vld [vmem:[#allocation4_spill] sm:$0xff] }
 0x3f4   : > { %1668 = vmatmul.bf16.gmra.mxu3 %v3355_v29  ;;  %v3474_v29 = vpop.f32.mrf.mxu3 }
 0x3f5   : > { %4115 = vst [vmem:[#allocation17_spill] sm:$0xff] %v3474_v29 }
 0x3f6   : > { %v3457_v13 = vpop.f32.mrf.mxu0 }
 0x3f7   : > { %1766 = vmatpush.bf16.msra.mxu0 %v2972_v21 }
 0x3fb   : > { %1767 = vmatpush.bf16.msra.mxu0 %v2971_v50 }
 0x3fc   : > { %v3479_v24 = vpop.f32.mrf.mxu3 }
 0x3fd   : > { %4116 = vst [vmem:[#allocation18_spill] sm:$0xff] %v3479_v24 }
 0x3fe   : > { %v3461_v17 = vpop.f32.mrf.mxu0 }
 0x401   : > { %1284 = vmatmul.bf16.gmra.mxu1 %v3128_v25  ;;  %1235 = vmatmul.bf16.gmra.mxu0 %v3207_v7 }
 0x404   : > { %1673 = vmatmul.bf16.gmra.mxu3 %v3366_v53  ;;  %v3486_v53 = vpop.f32.mrf.mxu3 }
 0x405   : > { %4117 = vst [vmem:[#allocation19_spill] sm:$0xff] %v3486_v53 }
 0x406   : > { %v3466_v39 = vpop.f32.mrf.mxu0 }
 0x40c   : > { %v3492_v56 = vpop.f32.mrf.mxu3 }
 0x40d   : > { %4118 = vst [vmem:[#allocation20_spill] sm:$0xff] %v3492_v56 }
 0x40e   : > { %v3470_v42 = vpop.f32.mrf.mxu0 }
 0x411   : > { %1289 = vmatmul.bf16.gmra.mxu1 %v3138_v31  ;;  %1240 = vmatmul.bf16.gmra.mxu0 %v3220_v18 }
 0x414   : > { %1678 = vmatmul.bf16.gmra.mxu3 %v3377_v10  ;;  %v3505_v60 = vpop.f32.mrf.mxu3 }
 0x415   : > { %4119 = vst [vmem:[#allocation21_spill] sm:$0xff] %v3505_v60 }
 0x416   : > { %v3477_v26 = vpop.f32.mrf.mxu0 }
 0x41c   : > { %v3523_v45 = vpop.f32.mrf.mxu3 }
 0x41d   : > { %4121 = vst [vmem:[#allocation7_spill] sm:$0xff] %v3523_v45 }
 0x41e   : > { %v3481_v62 = vpop.f32.mrf.mxu0 }
 0x421   : > { %1294 = vmatmul.bf16.gmra.mxu1 %v3148_v37  ;;  %1245 = vmatmul.bf16.gmra.mxu0 %v3237_v38 }
 0x424   : > { %1683 = vmatmul.bf16.gmra.mxu3 %v3396_v59  ;;  %v2966_v59 = vld [vmem:[%s4067_s4 + $0x78] sm:$0xff] }
 0x425   : > { %1473 = vmatpush.bf16.msrb.mxu2 %v2966_v59 }
 0x426   : > { %v3488_v23 = vpop.f32.mrf.mxu0 }
 0x42e   : > { %v3490_v14 = vpop.f32.mrf.mxu0 }
 0x431   : > { %1299 = vmatmul.bf16.gmra.mxu1 %v3158_v43  ;;  %1250 = vmatmul.bf16.gmra.mxu0 %v3252_v61 }
 0x434   : > { %1688 = vmatmul.bf16.gmra.mxu3 %v3413_v11  ;;  %v2965_v11 = vld [vmem:[%s4067_s4 + $0x70] sm:$0xff] }
 0x435   : > { %1474 = vmatpush.bf16.msrb.mxu2 %v2965_v11  ;;  %v3575_v11 = vld [vmem:[%s4066_s3 + $0x1] ss:$0 sm:$0xff] }
 0x436   : > { %v3497_v10 = vpop.f32.mrf.mxu0  ;;  %v1194_v21 = vadd.f32 %v3575_v11, %v3457_v13  ;;  %v1199_v13 = vadd.f32 %v3575_v11, %v3466_v39  ;;  %v1204_v39 = vadd.f32 %v3575_v11, %v3477_v26  ;;  %v1209_v26 = vadd.f32 %v3575_v11, %v3488_v23 }
 0x437   : > { %v1214_v23 = vadd.f32 %v3575_v11, %v3497_v10 }
 0x439   : > { %1475 = vmatpush.bf16.msrb.mxu2 %v2964_v57  ;;  %v1192_v57 = vadd.f32 %v3575_v11, %v3452_v44  ;;  %v1197_v44 = vadd.f32 %v3575_v11, %v3461_v17  ;;  %v1202_v17 = vadd.f32 %v3575_v11, %v3470_v42  ;;  %v1207_v42 = vadd.f32 %v3575_v11, %v3481_v62 }
 0x43a   : > { %v1212_v62 = vadd.f32 %v3575_v11, %v3490_v14 }
 0x43d   : > { %1476 = vmatpush.bf16.msrb.mxu2 %v2963_v30 }
 0x43e   : > { %v3507_v27 = vpop.f32.mrf.mxu0 }
 0x43f   : > { %v1217_v14 = vadd.f32 %v3575_v11, %v3507_v27 }
 0x441   : > { %1304 = vmatmul.bf16.gmra.mxu1 %v3168_v49  ;;  %1255 = vmatmul.bf16.gmra.mxu0 %v4120_v47 }
 0x442   : > { %1477 = vmatpush.bf16.msrb.mxu2 %v2962_v16 }
 0x444   : > { %1693 = vmatmul.bf16.gmra.mxu3 %v3418_v12  ;;  %v2970_v12 = vld [vmem:[%s4065_s2 + $0x98] sm:$0xff] }
 0x445   : > { %1768 = vmatpush.bf16.msra.mxu0 %v2970_v12 }
 0x446   : > { %v3526_v4 = vpop.f32.mrf.mxu0  ;;  %1478 = vmatpush.bf16.msrb.mxu2 %v2961_v3 }
 0x447   : > { %v1219_v10 = vadd.f32 %v3575_v11, %v3526_v4 }
 0x449   : > { %1769 = vmatpush.bf16.msra.mxu0 %v2969_v52 }
 0x44a   : > { %1479 = vmatpush.bf16.msrb.mxu2 %v2960_v5 }
 0x44d   : > { %1770 = vmatpush.bf16.msra.mxu0 %v2968_v2 }
 0x44e   : > { %v3540_v35 = vpop.f32.mrf.mxu0  ;;  %1480 = vmatpush.bf16.msrb.mxu2 %v2959_v32 }
 0x451   : > { %1309 = vmatmul.bf16.gmra.mxu1 %v4122_v58  ;;  %1260 = vmatmul.bf16.gmra.mxu0 %v4123_v36 }
 0x452   : > { %1771 = vmatpush.bf16.msra.mxu0 %v2967_v41  ;;  %v4127_v41 = vld [vmem:[#allocation5_spill] sm:$0xff] }
 0x456   : > { %v3556_v48 = vpop.f32.mrf.mxu0 }
 0x457   : > { %v1224_v4 = vadd.f32 %v3575_v11, %v3556_v48 }
 0x45e   : > { %v3564_v51 = vpop.f32.mrf.mxu0 }
 0x461   : > { %1314 = vmatmul.bf16.gmra.mxu1 %v4124_v6  ;;  %1265 = vmatmul.bf16.gmra.mxu0 %v4125_v0 }
 0x466   : > { %v3568_v33 = vpop.f32.mrf.mxu0 }
 0x467   : > { %v1229_v29 = vadd.f32 %v3575_v11, %v3568_v33 }
 0x46e   : > { %v1280_v59 = vpop.f32.mrf.mxu1  ;;  %v3570_v63 = vpop.f32.mrf.mxu0 }
 0x46f   : > { %v1281_v30 = vadd.f32 %v1280_v59, %v1192_v57 }
 0x471   : > { %1319 = vmatmul.bf16.gmra.mxu1 %v4126_v9  ;;  %v1360_v3 = vmax.f32 %v1281_v30, 0.0 }
 0x476   : > { %v1282_v50 = vpop.f32.mrf.mxu1  ;;  %v3582_v16 = vpop.f32.mrf.mxu0 }
 0x477   : > { %v1283_v12 = vadd.f32 %v1282_v50, %v1194_v21 }
 0x479   : > { %v1361_v52 = vmax.f32 %v1283_v12, 0.0 }
 0x47b   : > { %v1392_v5 = vpack.c.bf16 %v1361_v52, %v1360_v3 }
 0x47d   : > { %1481 = vmatmul.bf16.vlgmr.msrb.gmra.mxu2 %v1392_v5  ;;  %1772 = vmatmul.bf16.vlgmr.msra.gmra.mxu0 %v1392_v5  ;;  %v4128_v5 = vld [vmem:[#allocation6_spill] sm:$0xff] }
 0x47e   : > { %v1285_v2 = vpop.f32.mrf.mxu1  ;;  %v3584_v32 = vpop.f32.mrf.mxu0 }
 0x47f   : > { %v1286_v59 = vadd.f32 %v1285_v2, %v1197_v44 }
 0x481   : > { %1324 = vmatmul.bf16.gmra.mxu1 %v4127_v41  ;;  %v1362_v30 = vmax.f32 %v1286_v59, 0.0 }
 0x486   : > { %v1287_v57 = vpop.f32.mrf.mxu1  ;;  %v3591_v45 = vpop.f32.mrf.mxu0 }
 0x487   : > { %v1288_v21 = vadd.f32 %v1287_v57, %v1199_v13 }
 0x489   : > { %v1363_v50 = vmax.f32 %v1288_v21, 0.0 }
 0x48b   : > { %v1393_v12 = vpack.c.bf16 %v1363_v50, %v1362_v30 }
 0x48d   : > { %1486 = vmatmul.bf16.gmra.mxu2 %v1393_v12  ;;  %1777 = vmatmul.bf16.gmra.mxu0 %v1393_v12  ;;  %v4129_v12 = vld [vmem:[#allocation8_spill] sm:$0xff] }
 0x48e   : > { %v1290_v3 = vpop.f32.mrf.mxu1  ;;  %v3593_v52 = vpop.f32.mrf.mxu0 }
 0x48f   : > { %v1291_v2 = vadd.f32 %v1290_v3, %v1202_v17 }
 0x491   : > { %1329 = vmatmul.bf16.gmra.mxu1 %v4128_v5  ;;  %v1364_v59 = vmax.f32 %v1291_v2, 0.0 }
 0x496   : > { %v1292_v44 = vpop.f32.mrf.mxu1  ;;  %v3600_v60 = vpop.f32.mrf.mxu0 }
 0x497   : > { %v1293_v13 = vadd.f32 %v1292_v44, %v1204_v39 }
 0x499   : > { %v1365_v57 = vmax.f32 %v1293_v13, 0.0 }
 0x49b   : > { %v1394_v21 = vpack.c.bf16 %v1365_v57, %v1364_v59 }
 0x49d   : > { %1491 = vmatmul.bf16.gmra.mxu2 %v1394_v21  ;;  %1782 = vmatmul.bf16.gmra.mxu0 %v1394_v21  ;;  %v4130_v21 = vld [vmem:[#allocation10_spill] sm:$0xff] }
 0x49e   : > { %v1295_v30 = vpop.f32.mrf.mxu1  ;;  %v3602_v50 = vpop.f32.mrf.mxu0 }
 0x49f   : > { %v1296_v3 = vadd.f32 %v1295_v30, %v1207_v42 }
 0x4a1   : > { %1334 = vmatmul.bf16.gmra.mxu1 %v4129_v12  ;;  %v1366_v2 = vmax.f32 %v1296_v3, 0.0 }
 0x4a6   : > { %v1297_v17 = vpop.f32.mrf.mxu1  ;;  %v3609_v56 = vpop.f32.mrf.mxu0 }
 0x4a7   : > { %v1298_v39 = vadd.f32 %v1297_v17, %v1209_v26 }
 0x4a9   : > { %v1367_v44 = vmax.f32 %v1298_v39, 0.0 }
 0x4ab   : > { %v1395_v13 = vpack.c.bf16 %v1367_v44, %v1366_v2 }
 0x4ad   : > { %1496 = vmatmul.bf16.gmra.mxu2 %v1395_v13  ;;  %1787 = vmatmul.bf16.gmra.mxu0 %v1395_v13  ;;  %v4131_v13 = vld [vmem:[#allocation12_spill] sm:$0xff] }
 0x4ae   : > { %v1300_v59 = vpop.f32.mrf.mxu1  ;;  %v3611_v57 = vpop.f32.mrf.mxu0 }
 0x4af   : > { %v1301_v30 = vadd.f32 %v1300_v59, %v1212_v62 }
 0x4b1   : > { %1339 = vmatmul.bf16.gmra.mxu1 %v4130_v21  ;;  %v1368_v3 = vmax.f32 %v1301_v30, 0.0 }
 0x4b6   : > { %v1302_v42 = vpop.f32.mrf.mxu1  ;;  %v3618_v53 = vpop.f32.mrf.mxu0 }
 0x4b7   : > { %v1303_v26 = vadd.f32 %v1302_v42, %v1214_v23 }
 0x4b9   : > { %v1369_v17 = vmax.f32 %v1303_v26, 0.0 }
 0x4bb   : > { %v1396_v39 = vpack.c.bf16 %v1369_v17, %v1368_v3  ;;  %v4132_v17 = vld [vmem:[#allocation13_spill] sm:$0xff] }
 0x4bd   : > { %1501 = vmatmul.bf16.gmra.mxu2 %v1396_v39  ;;  %1792 = vmatmul.bf16.gmra.mxu0 %v1396_v39  ;;  %v1222_v39 = vadd.f32 %v3575_v11, %v3540_v35  ;;  %v1227_v35 = vadd.f32 %v3575_v11, %v3564_v51  ;;  %v1234_v51 = vadd.f32 %v3575_v11, %v3582_v16 }
 0x4be   : > { %v1305_v2 = vpop.f32.mrf.mxu1  ;;  %v3620_v44 = vpop.f32.mrf.mxu0  ;;  %v1239_v16 = vadd.f32 %v3575_v11, %v3591_v45  ;;  %v1244_v45 = vadd.f32 %v3575_v11, %v3600_v60  ;;  %v1249_v60 = vadd.f32 %v3575_v11, %v3609_v56  ;;  %v1252_v56 = vadd.f32 %v3575_v11, %v3611_v57 }
 0x4bf   : > { %v1306_v59 = vadd.f32 %v1305_v2, %v1217_v14  ;;  %v1257_v57 = vadd.f32 %v3575_v11, %v3620_v44 }
 0x4c1   : > { %1344 = vmatmul.bf16.gmra.mxu1 %v4131_v13  ;;  %v1370_v23 = vmax.f32 %v1306_v59, 0.0 }
 0x4c6   : > { %v1307_v62 = vpop.f32.mrf.mxu1  ;;  %v3627_v42 = vpop.f32.mrf.mxu0 }
 0x4c7   : > { %v1308_v24 = vadd.f32 %v1307_v62, %v1219_v10 }
 0x4c9   : > { %v1371_v30 = vmax.f32 %v1308_v24, 0.0 }
 0x4cb   : > { %v1397_v26 = vpack.c.bf16 %v1371_v30, %v1370_v23 }
 0x4cd   : > { %1506 = vmatmul.bf16.gmra.mxu2 %v1397_v26  ;;  %1797 = vmatmul.bf16.gmra.mxu0 %v1397_v26  ;;  %v4133_v26 = vld [vmem:[#allocation14_spill] sm:$0xff] }
 0x4ce   : > { %v1310_v3 = vpop.f32.mrf.mxu1  ;;  %v3632_v27 = vpop.f32.mrf.mxu0 }
 0x4cf   : > { %v1311_v2 = vadd.f32 %v1310_v3, %v1222_v39  ;;  %v1262_v44 = vadd.f32 %v3575_v11, %v3632_v27 }
 0x4d1   : > { %1349 = vmatmul.bf16.gmra.mxu1 %v4132_v17  ;;  %v1372_v24 = vmax.f32 %v1311_v2, 0.0 }
 0x4d6   : > { %v1312_v14 = vpop.f32.mrf.mxu1  ;;  %v3636_v23 = vpop.f32.mrf.mxu0 }
 0x4d7   : > { %v1313_v10 = vadd.f32 %v1312_v14, %v1224_v4 }
 0x4d9   : > { %v1373_v59 = vmax.f32 %v1313_v10, 0.0 }
 0x4db   : > { %v1398_v62 = vpack.c.bf16 %v1373_v59, %v1372_v24 }
 0x4dd   : > { %1511 = vmatmul.bf16.gmra.mxu2 %v1398_v62  ;;  %1802 = vmatmul.bf16.gmra.mxu0 %v1398_v62  ;;  %v1232_v62 = vadd.f32 %v3575_v11, %v3570_v63 }
 0x4de   : > { %v1315_v30 = vpop.f32.mrf.mxu1  ;;  %v3643_v4 = vpop.f32.mrf.mxu0 }
 0x4df   : > { %v1316_v48 = vadd.f32 %v1315_v30, %v1227_v35 }
 0x4e1   : > { %1354 = vmatmul.bf16.gmra.mxu1 %v4133_v26  ;;  %v1374_v2 = vmax.f32 %v1316_v48, 0.0 }
 0x4e6   : > { %v1317_v3 = vpop.f32.mrf.mxu1  ;;  %v3645_v59 = vpop.f32.mrf.mxu0 }
 0x4e7   : > { %v1318_v39 = vadd.f32 %v1317_v3, %v1229_v29 }
 0x4e9   : > { %v1375_v14 = vmax.f32 %v1318_v39, 0.0 }
 0x4eb   : > { %v1399_v10 = vpack.c.bf16 %v1375_v14, %v1374_v2  ;;  %v1237_v14 = vadd.f32 %v3575_v11, %v3584_v32  ;;  %v1242_v32 = vadd.f32 %v3575_v11, %v3593_v52  ;;  %v1247_v52 = vadd.f32 %v3575_v11, %v3602_v50 }
 0x4ed   : > { %1516 = vmatmul.bf16.gmra.mxu2 %v1399_v10  ;;  %1807 = vmatmul.bf16.gmra.mxu0 %v1399_v10 }
 0x4ee   : > { %v1320_v24 = vpop.f32.mrf.mxu1 }
 0x4ef   : > { %v1321_v33 = vadd.f32 %v1320_v24, %v1232_v62 }
 0x4f1   : > { %v1376_v29 = vmax.f32 %v1321_v33, 0.0 }
 0x4f6   : > { %v1322_v30 = vpop.f32.mrf.mxu1 }
 0x4f7   : > { %v1323_v35 = vadd.f32 %v1322_v30, %v1234_v51 }
 0x4f9   : > { %v1377_v3 = vmax.f32 %v1323_v35, 0.0 }
 0x4fa   : > { %v3651_v20 = vpop.f32.mrf.mxu0 }
 0x4fb   : > { %v1400_v48 = vpack.c.bf16 %v1377_v3, %v1376_v29 }
 0x4fd   : > { %1521 = vmatmul.bf16.gmra.mxu2 %v1400_v48  ;;  %1812 = vmatmul.bf16.gmra.mxu0 %v1400_v48 }
 0x4fe   : > { %v1325_v39 = vpop.f32.mrf.mxu1 }
 0x4ff   : > { %v1326_v10 = vadd.f32 %v1325_v39, %v1237_v14 }
 0x501   : > { %v1378_v51 = vmax.f32 %v1326_v10, 0.0 }
 0x502   : > { %v3653_v2 = vpop.f32.mrf.mxu0 }
 0x506   : > { %v1327_v24 = vpop.f32.mrf.mxu1 }
 0x507   : > { %v1328_v62 = vadd.f32 %v1327_v24, %v1239_v16 }
 0x509   : > { %v1379_v33 = vmax.f32 %v1328_v62, 0.0 }
 0x50a   : > { %v3661_v30 = vpop.f32.mrf.mxu0 }
 0x50b   : > { %v1401_v35 = vpack.c.bf16 %v1379_v33, %v1378_v51 }
 0x50d   : > { %1526 = vmatmul.bf16.gmra.mxu2 %v1401_v35  ;;  %1817 = vmatmul.bf16.gmra.mxu0 %v1401_v35 }
 0x50e   : > { %v1330_v29 = vpop.f32.mrf.mxu1 }
 0x50f   : > { %v1331_v39 = vadd.f32 %v1330_v29, %v1242_v32 }
 0x511   : > { %v1380_v10 = vmax.f32 %v1331_v39, 0.0 }
 0x512   : > { %v3663_v3 = vpop.f32.mrf.mxu0 }
 0x516   : > { %v1332_v14 = vpop.f32.mrf.mxu1 }
 0x517   : > { %v1333_v16 = vadd.f32 %v1332_v14, %v1244_v45  ;;  %v3681_v45 = vpop.f32.mrf.mxu2 }
 0x518   : > { %4134 = vst [vmem:[#allocation2_spill] sm:$0xff] %v3681_v45 }
 0x519   : > { %v1381_v24 = vmax.f32 %v1333_v16, 0.0 }
 0x51a   : > { %v3671_v62 = vpop.f32.mrf.mxu0 }
 0x51b   : > { %v1402_v51 = vpack.c.bf16 %v1381_v24, %v1380_v10 }
 0x51d   : > { %1531 = vmatmul.bf16.gmra.mxu2 %v1402_v51  ;;  %1822 = vmatmul.bf16.gmra.mxu0 %v1402_v51 }
 0x51e   : > { %v1335_v33 = vpop.f32.mrf.mxu1 }
 0x51f   : > { %v1336_v29 = vadd.f32 %v1335_v33, %v1247_v52  ;;  %v3685_v50 = vpop.f32.mrf.mxu2  ;;  %v1254_v52 = vadd.f32 %v3575_v11, %v3618_v53  ;;  %v1259_v33 = vadd.f32 %v3575_v11, %v3627_v42  ;;  %v1264_v42 = vadd.f32 %v3575_v11, %v3636_v23 }
 0x520   : > { %4135 = vst [vmem:[#allocation9_spill] sm:$0xff] %v3685_v50  ;;  %v1269_v23 = vadd.f32 %v3575_v11, %v3645_v59 }
 0x521   : > { %v1382_v14 = vmax.f32 %v1336_v29, 0.0 }
 0x522   : > { %v3673_v35 = vpop.f32.mrf.mxu0 }
 0x526   : > { %v1337_v32 = vpop.f32.mrf.mxu1 }
 0x527   : > { %v1338_v39 = vadd.f32 %v1337_v32, %v1249_v60 }
 0x529   : > { %v1383_v16 = vmax.f32 %v1338_v39, 0.0 }
 0x52a   : > { %v3683_v10 = vpop.f32.mrf.mxu0 }
 0x52b   : > { %v1403_v24 = vpack.c.bf16 %v1383_v16, %v1382_v14 }
 0x52d   : > { %1536 = vmatmul.bf16.gmra.mxu2 %v1403_v24  ;;  %1827 = vmatmul.bf16.gmra.mxu0 %v1403_v24  ;;  %v3695_v24 = vpop.f32.mrf.mxu2 }
 0x52e   : > { %v1340_v51 = vpop.f32.mrf.mxu1  ;;  %4136 = vst [vmem:[#allocation3_spill] sm:$0xff] %v3695_v24 }
 0x52f   : > { %v1341_v60 = vadd.f32 %v1340_v51, %v1252_v56 }
 0x531   : > { %v1384_v39 = vmax.f32 %v1341_v60, 0.0 }
 0x532   : > { %v3687_v48 = vpop.f32.mrf.mxu0 }
 0x535   : > { %v3701_v53 = vpop.f32.mrf.mxu2 }
 0x536   : > { %v1342_v29 = vpop.f32.mrf.mxu1  ;;  %4137 = vst [vmem:[#allocation11_spill] sm:$0xff] %v3701_v53 }
 0x537   : > { %v1343_v32 = vadd.f32 %v1342_v29, %v1254_v52 }
 0x539   : > { %v1385_v14 = vmax.f32 %v1343_v32, 0.0 }
 0x53a   : > { %v1793_v16 = vpop.f32.mrf.mxu0 }
 0x53b   : > { %v1404_v63 = vpack.c.bf16 %v1385_v14, %v1384_v39 }
 0x53d   : > { %1541 = vmatmul.bf16.gmra.mxu2 %v1404_v63  ;;  %1832 = vmatmul.bf16.gmra.mxu0 %v1404_v63  ;;  %v3703_v39 = vpop.f32.mrf.mxu2 }
 0x53e   : > { %v1345_v50 = vpop.f32.mrf.mxu1  ;;  %4138 = vst [vmem:[#allocation4_spill] sm:$0xff] %v3703_v39  ;;  %v1267_v39 = vadd.f32 %v3575_v11, %v3643_v4 }
 0x53f   : > { %v1346_v51 = vadd.f32 %v1345_v50, %v1257_v57 }
 0x541   : > { %v1386_v60 = vmax.f32 %v1346_v51, 0.0 }
 0x542   : > { %v1795_v54 = vpop.f32.mrf.mxu0 }
 0x543   : > { %v1857_v11 = vpack.c.bf16 %v1795_v54, %v1793_v16 }
 0x546   : > { %v1347_v56 = vpop.f32.mrf.mxu1 }
 0x547   : > { %v1348_v52 = vadd.f32 %v1347_v56, %v1259_v33  ;;  %v3709_v33 = vpop.f32.mrf.mxu2 }
 0x548   : > { %4139 = vst [vmem:[#allocation5_spill] sm:$0xff] %v3709_v33 }
 0x549   : > { %v1387_v29 = vmax.f32 %v1348_v52, 0.0 }
 0x54a   : > { %v1798_v32 = vpop.f32.mrf.mxu0 }
 0x54b   : > { %v1405_v24 = vpack.c.bf16 %v1387_v29, %v1386_v60 }
 0x54d   : > { %1546 = vmatmul.bf16.gmra.mxu2 %v1405_v24  ;;  %1837 = vmatmul.bf16.gmra.mxu0 %v1405_v24 }
 0x54e   : > { %v1350_v63 = vpop.f32.mrf.mxu1 }
 0x54f   : > { %v1351_v53 = vadd.f32 %v1350_v63, %v1262_v44  ;;  %v3713_v27 = vpop.f32.mrf.mxu2 }
 0x550   : > { %4140 = vst [vmem:[#allocation6_spill] sm:$0xff] %v3713_v27 }
 0x551   : > { %v1388_v51 = vmax.f32 %v1351_v53, 0.0 }
 0x552   : > { %v1800_v14 = vpop.f32.mrf.mxu0 }
 0x553   : > { %v1858_v45 = vpack.c.bf16 %v1800_v14, %v1798_v32 }
 0x556   : > { %v1352_v50 = vpop.f32.mrf.mxu1 }
 0x557   : > { %v1353_v57 = vadd.f32 %v1352_v50, %v1264_v42 }
 0x559   : > { %v1389_v56 = vmax.f32 %v1353_v57, 0.0 }
 0x55a   : > { %v1803_v52 = vpop.f32.mrf.mxu0 }
 0x55b   : > { %v1406_v60 = vpack.c.bf16 %v1389_v56, %v1388_v51  ;;  %v3717_v51 = vpop.f32.mrf.mxu2 }
 0x55d   : > { %1551 = vmatmul.bf16.gmra.mxu2 %v1406_v60  ;;  %1842 = vmatmul.bf16.gmra.mxu0 %v1406_v60 }
 0x55e   : > { %v1355_v24 = vpop.f32.mrf.mxu1 }
 0x55f   : > { %v1356_v63 = vadd.f32 %v1355_v24, %v1267_v39  ;;  %v4141_v24 = vpack.c.bf16 %v3687_v48, %v3683_v10 }
 0x561   : > { %v1390_v50 = vmax.f32 %v1356_v63, 0.0 }
 0x562   : > { %v1805_v29 = vpop.f32.mrf.mxu0 }
 0x563   : > { %v1859_v4 = vpack.c.bf16 %v1805_v29, %v1803_v52  ;;  %v4143_v52 = vpack.c.bf16 %v3663_v3, %v3661_v30 }
 0x566   : > { %v1357_v44 = vpop.f32.mrf.mxu1 }
 0x567   : > { %v1358_v42 = vadd.f32 %v1357_v44, %v1269_v23  ;;  %v4142_v23 = vpack.c.bf16 %v3673_v35, %v3671_v62  ;;  %v3733_v62 = vpop.f32.mrf.mxu2 }
 0x569   : > { %v1391_v53 = vmax.f32 %v1358_v42, 0.0 }
 0x56a   : > { %v1808_v57 = vpop.f32.mrf.mxu0 }
 0x56b   : > { %v1407_v33 = vpack.c.bf16 %v1391_v53, %v1390_v50 }
 0x56d   : > { %1556 = vmatmul.bf16.gmra.mxu2 %v1407_v33  ;;  %1847 = vmatmul.bf16.gmra.mxu0 %v1407_v33 }
 0x56f   : > { %v3735_v29 = vpop.f32.mrf.mxu2 }
 0x572   : > { %v1810_v56 = vpop.f32.mrf.mxu0 }
 0x573   : > { %v1860_v60 = vpack.c.bf16 %v1810_v56, %v1808_v57 }
 0x575   : > { %1874 = vmatpush.bf16.msra.mxu1 %v1860_v60 }
 0x579   : > { %1875 = vmatpush.bf16.msra.mxu1 %v1859_v4 }
 0x57a   : > { %v1813_v27 = vpop.f32.mrf.mxu0 }
 0x57d   : > { %1876 = vmatpush.bf16.msra.mxu1 %v1858_v45  ;;  %v4144_v45 = vpack.c.bf16 %v3653_v2, %v3651_v20  ;;  %v3738_v2 = vpop.f32.mrf.mxu2 }
 0x581   : > { %1877 = vmatpush.bf16.msra.mxu1 %v1857_v11 }
 0x582   : > { %v1815_v59 = vpop.f32.mrf.mxu0 }
 0x583   : > { %v1861_v39 = vpack.c.bf16 %v1815_v59, %v1813_v27 }
 0x585   : > { %1878 = vmatpush.bf16.msra.mxu1 %v4141_v24 }
 0x589   : > { %1879 = vmatpush.bf16.msra.mxu1 %v4142_v23 }
 0x58a   : > { %v1818_v33 = vpop.f32.mrf.mxu0 }
 0x58d   : > { %1880 = vmatpush.bf16.msra.mxu1 %v4143_v52 }
 0x591   : > { %1881 = vmatpush.bf16.msra.mxu1 %v4144_v45 }
 0x592   : > { %v1820_v54 = vpop.f32.mrf.mxu0 }
 0x593   : > { %v1862_v16 = vpack.c.bf16 %v1820_v54, %v1818_v33 }
 0x594   : > { %1882 = vmatmul.bf16.vlgmr.msra.gmra.mxu1 %v3104_v1  ;;  %v3741_v1 = vpop.f32.mrf.mxu2 }
 0x59a   : > { %v1823_v32 = vpop.f32.mrf.mxu0 }
 0x59c   : > { %v3743_v63 = vpop.f32.mrf.mxu2 }
 0x5a2   : > { %v1825_v48 = vpop.f32.mrf.mxu0 }
 0x5a3   : > { %v1863_v10 = vpack.c.bf16 %v1825_v48, %v1823_v32  ;;  %v2978_v48 = vld [vmem:[%s4067_s4 + $0x98] sm:$0xff] }
 0x5a4   : > { %1887 = vmatmul.bf16.gmra.mxu1 %v3109_v8  ;;  %v3746_v42 = vpop.f32.mrf.mxu2 }
 0x5aa   : > { %v1828_v35 = vpop.f32.mrf.mxu0 }
 0x5b2   : > { %v1830_v14 = vpop.f32.mrf.mxu0 }
 0x5b3   : > { %v1864_v30 = vpack.c.bf16 %v1830_v14, %v1828_v35  ;;  %v2977_v14 = vld [vmem:[%s4067_s4 + $0x90] sm:$0xff] }
 0x5b4   : > { %1892 = vmatmul.bf16.gmra.mxu1 %v3114_v15  ;;  %v3749_v15 = vpop.f32.mrf.mxu2 }
 0x5ba   : > { %v1833_v20 = vpop.f32.mrf.mxu0 }
 0x5bc   : > { %v3751_v57 = vpop.f32.mrf.mxu2 }
 0x5c2   : > { %v1835_v3 = vpop.f32.mrf.mxu0 }
 0x5c3   : > { %v1865_v11 = vpack.c.bf16 %v1835_v3, %v1833_v20 }
 0x5c4   : > { %1897 = vmatmul.bf16.gmra.mxu1 %v3124_v22  ;;  %v3754_v4 = vpop.f32.mrf.mxu2 }
 0x5ca   : > { %v1838_v27 = vpop.f32.mrf.mxu0 }
 0x5cc   : > { %v3756_v59 = vpop.f32.mrf.mxu2 }
 0x5d2   : > { %v1840_v8 = vpop.f32.mrf.mxu0 }
 0x5d4   : > { %1902 = vmatmul.bf16.gmra.mxu1 %v3134_v28  ;;  %v1866_v28 = vpack.c.bf16 %v1840_v8, %v1838_v27 }
 0x5da   : > { %v1843_v44 = vpop.f32.mrf.mxu0 }
 0x5e2   : > { %v1845_v50 = vpop.f32.mrf.mxu0 }
 0x5e3   : > { %v1867_v60 = vpack.c.bf16 %v1845_v50, %v1843_v44 }
 0x5e4   : > { %1907 = vmatmul.bf16.gmra.mxu1 %v3144_v34  ;;  %v3759_v34 = vpop.f32.mrf.mxu2 }
 0x5ea   : > { %v1848_v53 = vpop.f32.mrf.mxu0 }
 0x5f2   : > { %v1850_v22 = vpop.f32.mrf.mxu0 }
 0x5f3   : > { %v1868_v56 = vpack.c.bf16 %v1850_v22, %v1848_v53 }
 0x5f4   : > { %1912 = vmatmul.bf16.gmra.mxu1 %v3154_v40  ;;  %v3763_v40 = vpop.f32.mrf.mxu2 }
 0x5f5   : > { %1963 = vmatpush.bf16.msra.mxu2 %v1868_v56 }
 0x5f9   : > { %1964 = vmatpush.bf16.msra.mxu2 %v1867_v60 }
 0x5fc   : > { %v3765_v24 = vpop.f32.mrf.mxu2 }
 0x5fd   : > { %1965 = vmatpush.bf16.msra.mxu2 %v1866_v28 }
 0x601   : > { %1966 = vmatpush.bf16.msra.mxu2 %v1865_v11 }
 0x604   : > { %1917 = vmatmul.bf16.gmra.mxu1 %v3164_v46  ;;  %v3769_v23 = vpop.f32.mrf.mxu2 }
 0x605   : > { %1967 = vmatpush.bf16.msra.mxu2 %v1864_v30 }
 0x609   : > { %1968 = vmatpush.bf16.msra.mxu2 %v1863_v10 }
 0x60c   : > { %v3773_v46 = vpop.f32.mrf.mxu2 }
 0x60d   : > { %1969 = vmatpush.bf16.msra.mxu2 %v1862_v16 }
 0x611   : > { %1970 = vmatpush.bf16.msra.mxu2 %v1861_v39  ;;  %v3775_v39 = vpop.f32.mrf.mxu3  ;;  %v1883_v16 = vpop.f32.mrf.mxu1 }
 0x614   : > { %1971 = vmatmul.bf16.vlgmr.msra.gmra.mxu2 %v3118_v19  ;;  %1922 = vmatmul.bf16.gmra.mxu1 %v3183_v55  ;;  %v3777_v19 = vpop.f32.mrf.mxu2 }
 0x619   : > { %v3781_v55 = vpop.f32.mrf.mxu3  ;;  %v1885_v10 = vpop.f32.mrf.mxu1 }
 0x621   : > { %v1888_v20 = vpop.f32.mrf.mxu1 }
 0x624   : > { %1976 = vmatmul.bf16.gmra.mxu2 %v3128_v25  ;;  %1927 = vmatmul.bf16.gmra.mxu1 %v3207_v7  ;;  %v3783_v25 = vpop.f32.mrf.mxu2  ;;  %v3785_v7 = vpop.f32.mrf.mxu3 }
 0x629   : > { %v1890_v8 = vpop.f32.mrf.mxu1 }
 0x62c   : > { %v3787_v33 = vpop.f32.mrf.mxu2 }
 0x631   : > { %v1893_v50 = vpop.f32.mrf.mxu1 }
 0x634   : > { %1981 = vmatmul.bf16.gmra.mxu2 %v3138_v31  ;;  %1932 = vmatmul.bf16.gmra.mxu1 %v3220_v18  ;;  %v3790_v31 = vpop.f32.mrf.mxu3  ;;  %v3792_v18 = vpop.f32.mrf.mxu2 }
 0x639   : > { %v1895_v56 = vpop.f32.mrf.mxu1 }
 0x63c   : > { %v3794_v52 = vpop.f32.mrf.mxu3  ;;  %v3803_v45 = vpop.f32.mrf.mxu2 }
 0x641   : > { %v1898_v28 = vpop.f32.mrf.mxu1 }
 0x644   : > { %1986 = vmatmul.bf16.gmra.mxu2 %v3148_v37  ;;  %1937 = vmatmul.bf16.gmra.mxu1 %v3237_v38  ;;  %v2982_v37 = vld [vmem:[%s4067_s4 + $0xb8] sm:$0xff]  ;;  %v2981_v38 = vld [vmem:[%s4067_s4 + $0xb0] sm:$0xff]  ;;  %v3808_v54 = vpop.f32.mrf.mxu3  ;;  %v3813_v32 = vpop.f32.mrf.mxu2 }
 0x645   : > { %2165 = vmatpush.bf16.msra.mxu3 %v2982_v37  ;;  %4145 = vst [vmem:[#allocation8_spill] sm:$0xff] %v3813_v32 }
 0x649   : > { %2166 = vmatpush.bf16.msra.mxu3 %v2981_v38 }
 0x64c   : > { %v3820_v35 = vpop.f32.mrf.mxu3  ;;  %v3825_v30 = vpop.f32.mrf.mxu2 }
 0x64d   : > { %4146 = vst [vmem:[#allocation10_spill] sm:$0xff] %v3825_v30 }
 0x654   : > { %1991 = vmatmul.bf16.gmra.mxu2 %v3158_v43  ;;  %v2980_v43 = vld [vmem:[%s4067_s4 + $0xa8] sm:$0xff]  ;;  %1942 = vmatmul.bf16.gmra.mxu1 %v3252_v61  ;;  %v3830_v3 = vpop.f32.mrf.mxu3  ;;  %v2975_v61 = vld [vmem:[%s4067_s4 + $0x80] sm:$0xff]  ;;  %v3836_v27 = vpop.f32.mrf.mxu2 }
 0x655   : > { %2167 = vmatpush.bf16.msra.mxu3 %v2980_v43  ;;  %4147 = vst [vmem:[#allocation12_spill] sm:$0xff] %v3836_v27 }
 0x65c   : > { %v3839_v44 = vpop.f32.mrf.mxu3  ;;  %v3841_v53 = vpop.f32.mrf.mxu2 }
 0x65d   : > { %4148 = vst [vmem:[#allocation13_spill] sm:$0xff] %v3841_v53 }
 0x664   : > { %1996 = vmatmul.bf16.gmra.mxu2 %v3168_v49  ;;  %v2979_v49 = vld [vmem:[%s4067_s4 + $0xa0] sm:$0xff]  ;;  %1947 = vmatmul.bf16.gmra.mxu1 %v4120_v47  ;;  %v3844_v22 = vpop.f32.mrf.mxu3 }
 0x665   : > { %2168 = vmatpush.bf16.msra.mxu3 %v2979_v49 }
 0x669   : > { %2169 = vmatpush.bf16.msra.mxu3 %v2978_v48 }
 0x66c   : > { %v3854_v38 = vpop.f32.mrf.mxu3 }
 0x66d   : > { %2170 = vmatpush.bf16.msra.mxu3 %v2977_v14 }
 0x674   : > { %2001 = vmatmul.bf16.gmra.mxu2 %v4122_v58  ;;  %v2976_v58 = vld [vmem:[%s4067_s4 + $0x88] sm:$0xff]  ;;  %1952 = vmatmul.bf16.gmra.mxu1 %v4123_v36  ;;  %v1900_v36 = vpop.f32.mrf.mxu1 }
 0x675   : > { %2171 = vmatpush.bf16.msra.mxu3 %v2976_v58 }
 0x679   : > { %2172 = vmatpush.bf16.msra.mxu3 %v2975_v61  ;;  %v3858_v61 = vpop.f32.mrf.mxu3 }
 0x684   : > { %2006 = vmatmul.bf16.gmra.mxu2 %v4124_v6  ;;  %v3850_v6 = vld [vmem:[%s4066_s3 + $0x2] ss:$0 sm:$0xff]  ;;  %1957 = vmatmul.bf16.gmra.mxu1 %v4125_v0 }
 0x685   : > { %v1884_v47 = vadd.f32 %v3850_v6, %v1883_v16  ;;  %v1886_v37 = vadd.f32 %v3850_v6, %v1885_v10  ;;  %v1889_v16 = vadd.f32 %v3850_v6, %v1888_v20 }
 0x694   : > { %2011 = vmatmul.bf16.gmra.mxu2 %v4126_v9 }
 0x697   : > { %v1972_v60 = vpop.f32.mrf.mxu2 }
 0x698   : > { %v1973_v11 = vadd.f32 %v1972_v60, %v1884_v47  ;;  %v1903_v60 = vpop.f32.mrf.mxu1  ;;  %v1891_v47 = vadd.f32 %v3850_v6, %v1890_v8  ;;  %v1896_v8 = vadd.f32 %v3850_v6, %v1895_v56 }
 0x69a   : > { %v2052_v49 = vmax.f32 %v1973_v11, 0.0 }
 0x69f   : > { %v1974_v9 = vpop.f32.mrf.mxu2 }
 0x6a0   : > { %v1975_v43 = vadd.f32 %v1974_v9, %v1886_v37  ;;  %v1905_v0 = vpop.f32.mrf.mxu1 }
 0x6a2   : > { %v2053_v48 = vmax.f32 %v1975_v43, 0.0  ;;  %v3862_v43 = vpop.f32.mrf.mxu3 }
 0x6a4   : > { %v2084_v14 = vpack.c.bf16 %v2053_v48, %v2052_v49  ;;  %2016 = vmatmul.bf16.gmra.mxu2 %v4127_v41  ;;  %v1894_v48 = vadd.f32 %v3850_v6, %v1893_v50  ;;  %v1899_v50 = vadd.f32 %v3850_v6, %v1898_v28 }
 0x6a6   : > { %2173 = vmatmul.bf16.vlgmr.msra.gmra.mxu3 %v2084_v14 }
 0x6a7   : > { %v1977_v58 = vpop.f32.mrf.mxu2 }
 0x6a8   : > { %v1978_v10 = vadd.f32 %v1977_v58, %v1889_v16  ;;  %v1908_v20 = vpop.f32.mrf.mxu1 }
 0x6aa   : > { %v2054_v11 = vmax.f32 %v1978_v10, 0.0  ;;  %v3866_v14 = vpop.f32.mrf.mxu3 }
 0x6af   : > { %v1979_v53 = vpop.f32.mrf.mxu2 }
 0x6b0   : > { %v1980_v37 = vadd.f32 %v1979_v53, %v1891_v47 }
 0x6b2   : > { %v2055_v9 = vmax.f32 %v1980_v37, 0.0 }
 0x6b4   : > { %2021 = vmatmul.bf16.gmra.mxu2 %v4128_v5  ;;  %v2085_v41 = vpack.c.bf16 %v2055_v9, %v2054_v11  ;;  %v1910_v5 = vpop.f32.mrf.mxu1  ;;  %v3870_v11 = vpop.f32.mrf.mxu3 }
 0x6b6   : > { %2178 = vmatmul.bf16.gmra.mxu3 %v2085_v41 }
 0x6b7   : > { %v1982_v49 = vpop.f32.mrf.mxu2 }
 0x6b8   : > { %v1983_v58 = vadd.f32 %v1982_v49, %v1894_v48  ;;  %v1901_v49 = vadd.f32 %v3850_v6, %v1900_v36 }
 0x6ba   : > { %v2056_v10 = vmax.f32 %v1983_v58, 0.0 }
 0x6bc   : > { %v1913_v41 = vpop.f32.mrf.mxu1  ;;  %v3874_v30 = vpop.f32.mrf.mxu3 }
 0x6bf   : > { %v1984_v16 = vpop.f32.mrf.mxu2 }
 0x6c0   : > { %v1985_v53 = vadd.f32 %v1984_v16, %v1896_v8 }
 0x6c2   : > { %v2057_v47 = vmax.f32 %v1985_v53, 0.0 }
 0x6c4   : > { %2026 = vmatmul.bf16.gmra.mxu2 %v4129_v12  ;;  %v2086_v37 = vpack.c.bf16 %v2057_v47, %v2056_v10  ;;  %v1915_v53 = vpop.f32.mrf.mxu1  ;;  %v1904_v10 = vadd.f32 %v3850_v6, %v1903_v60  ;;  %v3878_v47 = vpop.f32.mrf.mxu3 }
 0x6c6   : > { %2183 = vmatmul.bf16.gmra.mxu3 %v2086_v37  ;;  %v1906_v37 = vadd.f32 %v3850_v6, %v1905_v0 }
 0x6c7   : > { %v1987_v9 = vpop.f32.mrf.mxu2 }
 0x6c8   : > { %v1988_v27 = vadd.f32 %v1987_v9, %v1899_v50 }
 0x6ca   : > { %v2058_v58 = vmax.f32 %v1988_v27, 0.0 }
 0x6cc   : > { %v1918_v50 = vpop.f32.mrf.mxu1 }
 0x6cf   : > { %v1989_v48 = vpop.f32.mrf.mxu2 }
 0x6d0   : > { %v1990_v56 = vadd.f32 %v1989_v48, %v1901_v49 }
 0x6d2   : > { %v2059_v8 = vmax.f32 %v1990_v56, 0.0 }
 0x6d4   : > { %2031 = vmatmul.bf16.gmra.mxu2 %v4130_v21  ;;  %v2087_v12 = vpack.c.bf16 %v2059_v8, %v2058_v58  ;;  %v3882_v21 = vpop.f32.mrf.mxu3  ;;  %v1909_v58 = vadd.f32 %v3850_v6, %v1908_v20  ;;  %v1920_v60 = vpop.f32.mrf.mxu1  ;;  %v1914_v20 = vadd.f32 %v3850_v6, %v1913_v41 }
 0x6d6   : > { %2188 = vmatmul.bf16.gmra.mxu3 %v2087_v12  ;;  %v1911_v12 = vadd.f32 %v3850_v6, %v1910_v5 }
 0x6d7   : > { %v1992_v16 = vpop.f32.mrf.mxu2 }
 0x6d8   : > { %v1993_v28 = vadd.f32 %v1992_v16, %v1904_v10 }
 0x6da   : > { %v2060_v49 = vmax.f32 %v1993_v28, 0.0 }
 0x6dc   : > { %v3886_v16 = vpop.f32.mrf.mxu3 }
 0x6df   : > { %v1994_v36 = vpop.f32.mrf.mxu2 }
 0x6e0   : > { %v1995_v9 = vadd.f32 %v1994_v36, %v1906_v37 }
 0x6e2   : > { %v2061_v48 = vmax.f32 %v1995_v9, 0.0 }
 0x6e4   : > { %v2088_v27 = vpack.c.bf16 %v2061_v48, %v2060_v49  ;;  %2036 = vmatmul.bf16.gmra.mxu2 %v4131_v13  ;;  %v1923_v13 = vpop.f32.mrf.mxu1  ;;  %v3889_v49 = vpop.f32.mrf.mxu3 }
 0x6e5   : > { %4149 = vst [vmem:[#allocation14_spill] sm:$0xff] %v3889_v49 }
 0x6e6   : > { %2193 = vmatmul.bf16.gmra.mxu3 %v2088_v27  ;;  %v1916_v27 = vadd.f32 %v3850_v6, %v1915_v53  ;;  %v1921_v53 = vadd.f32 %v3850_v6, %v1920_v60 }
 0x6e7   : > { %v1997_v56 = vpop.f32.mrf.mxu2 }
 0x6e8   : > { %v1998_v8 = vadd.f32 %v1997_v56, %v1909_v58 }
 0x6ea   : > { %v2062_v37 = vmax.f32 %v1998_v8, 0.0 }
 0x6ec   : > { %v1925_v56 = vpop.f32.mrf.mxu1  ;;  %v3893_v8 = vpop.f32.mrf.mxu3 }
 0x6ed   : > { %4150 = vst [vmem:[#allocation22_spill] sm:$0xff] %v3893_v8 }
 0x6ef   : > { %v1999_v0 = vpop.f32.mrf.mxu2 }
 0x6f0   : > { %v2000_v10 = vadd.f32 %v1999_v0, %v1911_v12 }
 0x6f2   : > { %v2063_v28 = vmax.f32 %v2000_v10, 0.0 }
 0x6f4   : > { %v2089_v36 = vpack.c.bf16 %v2063_v28, %v2062_v37  ;;  %2041 = vmatmul.bf16.gmra.mxu2 %v4132_v17  ;;  %v1928_v10 = vpop.f32.mrf.mxu1  ;;  %v1919_v37 = vadd.f32 %v3850_v6, %v1918_v50  ;;  %v3897_v28 = vpop.f32.mrf.mxu3  ;;  %v1926_v50 = vadd.f32 %v3850_v6, %v1925_v56 }
 0x6f5   : > { %4151 = vst [vmem:[#allocation23_spill] sm:$0xff] %v3897_v28  ;;  %v1929_v56 = vadd.f32 %v3850_v6, %v1928_v10 }
 0x6f6   : > { %2198 = vmatmul.bf16.gmra.mxu3 %v2089_v36 }
 0x6f7   : > { %v2002_v9 = vpop.f32.mrf.mxu2 }
 0x6f8   : > { %v2003_v48 = vadd.f32 %v2002_v9, %v1914_v20 }
 0x6fa   : > { %v2064_v32 = vmax.f32 %v2003_v48, 0.0 }
 0x6ff   : > { %v2004_v5 = vpop.f32.mrf.mxu2 }
 0x700   : > { %v2005_v58 = vadd.f32 %v2004_v5, %v1916_v27  ;;  %v1930_v27 = vpop.f32.mrf.mxu1 }
 0x702   : > { %v2065_v12 = vmax.f32 %v2005_v58, 0.0  ;;  %v1924_v58 = vadd.f32 %v3850_v6, %v1923_v13  ;;  %v3911_v13 = vld [vmem:[%s4068_s5] ss:$0 sm:$0xff] }
 0x704   : > { %v2090_v0 = vpack.c.bf16 %v2065_v12, %v2064_v32  ;;  %2046 = vmatmul.bf16.gmra.mxu2 %v4133_v26  ;;  %v3900_v32 = vpop.f32.mrf.mxu3 }
 0x705   : > { %4152 = vst [vmem:[#allocation24_spill] sm:$0xff] %v3900_v32 }
 0x706   : > { %2203 = vmatmul.bf16.gmra.mxu3 %v2090_v0 }
 0x707   : > { %v2007_v17 = vpop.f32.mrf.mxu2 }
 0x708   : > { %v2008_v41 = vadd.f32 %v2007_v17, %v1919_v37  ;;  %v1933_v12 = vpop.f32.mrf.mxu1 }
 0x709   : > { %v1934_v49 = vadd.f32 %v3850_v6, %v1933_v12 }
 0x70a   : > { %v2066_v20 = vmax.f32 %v2008_v41, 0.0 }
 0x70c   : > { %v3904_v60 = vpop.f32.mrf.mxu3 }
 0x70d   : > { %4153 = vst [vmem:[#allocation25_spill] sm:$0xff] %v3904_v60 }
 0x70f   : > { %v2009_v36 = vpop.f32.mrf.mxu2 }
 0x710   : > { %v2010_v9 = vadd.f32 %v2009_v36, %v1921_v53 }
 0x712   : > { %v2067_v48 = vmax.f32 %v2010_v9, 0.0 }
 0x714   : > { %v2091_v5 = vpack.c.bf16 %v2067_v48, %v2066_v20  ;;  %v1935_v20 = vpop.f32.mrf.mxu1  ;;  %v4154_v48 = vld [vmem:[#allocation2_spill] sm:$0xff] }
 0x716   : > { %2208 = vmatmul.bf16.gmra.mxu3 %v2091_v5  ;;  %v4155_v5 = vld [vmem:[#allocation15_spill] sm:$0xff] }
 0x717   : > { %v2012_v26 = vpop.f32.mrf.mxu2  ;;  %v1620_v32 = vadd.f32 %v4155_v5, %v4154_v48 }
 0x718   : > { %v2013_v0 = vadd.f32 %v2012_v26, %v1924_v58 }
 0x71a   : > { %v2068_v53 = vmax.f32 %v2013_v0, 0.0 }
 0x71c   : > { %v1938_v48 = vpop.f32.mrf.mxu1 }
 0x71f   : > { %v2014_v17 = vpop.f32.mrf.mxu2 }
 0x720   : > { %v2015_v37 = vadd.f32 %v2014_v17, %v1926_v50  ;;  %v1931_v17 = vadd.f32 %v3850_v6, %v1930_v27 }
 0x722   : > { %v2069_v41 = vmax.f32 %v2015_v37, 0.0 }
 0x724   : > { %v2092_v36 = vpack.c.bf16 %v2069_v41, %v2068_v53  ;;  %v4156_v53 = vld [vmem:[#allocation9_spill] sm:$0xff]  ;;  %v4157_v41 = vld [vmem:[#allocation16_spill] sm:$0xff] }
 0x726   : > { %2213 = vmatmul.bf16.gmra.mxu3 %v2092_v36  ;;  %v1622_v36 = vadd.f32 %v4157_v41, %v4156_v53  ;;  %v1936_v41 = vadd.f32 %v3850_v6, %v1935_v20 }
 0x727   : > { %v2017_v9 = vpop.f32.mrf.mxu2 }
 0x728   : > { %v2018_v50 = vadd.f32 %v2017_v9, %v1929_v56  ;;  %v4158_v56 = vld [vmem:[#allocation3_spill] sm:$0xff] }
 0x729   : > { %v2174_v26 = vpop.f32.mrf.mxu3 }
 0x72a   : > { %v2254_v58 = vadd.f32 %v2174_v26, %v1620_v32  ;;  %v2070_v5 = vmax.f32 %v2018_v50, 0.0 }
 0x72c   : > { %v2290_v0 = vadd.f32 %v3911_v13, %v2254_v58  ;;  %v4159_v58 = vld [vmem:[#allocation17_spill] sm:$0xff] }
 0x72d   : > { %v1625_v27 = vadd.f32 %v4159_v58, %v4158_v56 }
 0x72e   : > { %2322 = vst [vmem:[%s3919_s7] sm:$0xff] %v2290_v0 }
 0x72f   : > { %v2019_v37 = vpop.f32.mrf.mxu2 }
 0x730   : > { %v2020_v10 = vadd.f32 %v2019_v37, %v1931_v17  ;;  %v1940_v17 = vpop.f32.mrf.mxu1 }
 0x731   : > { %v2176_v32 = vpop.f32.mrf.mxu3 }
 0x732   : > { %v2071_v26 = vmax.f32 %v2020_v10, 0.0  ;;  %v2255_v60 = vadd.f32 %v2176_v32, %v1622_v36 }
 0x734   : > { %v2093_v28 = vpack.c.bf16 %v2071_v26, %v2070_v5  ;;  %v2291_v8 = vadd.f32 %v3911_v13, %v2255_v60  ;;  %v4160_v60 = vld [vmem:[#allocation11_spill] sm:$0xff] }
 0x736   : > { %2323 = vst [vmem:[%s3919_s7 + $0x8] sm:$0xff] %v2291_v8  ;;  %2218 = vmatmul.bf16.gmra.mxu3 %v2093_v28  ;;  %v4161_v8 = vld [vmem:[#allocation18_spill] sm:$0xff] }
 0x737   : > { %v2022_v9 = vpop.f32.mrf.mxu2  ;;  %v1627_v28 = vadd.f32 %v4161_v8, %v4160_v60  ;;  %v1941_v60 = vadd.f32 %v3850_v6, %v1940_v17 }
 0x738   : > { %v2023_v50 = vadd.f32 %v2022_v9, %v1934_v49  ;;  %v4162_v9 = vld [vmem:[#allocation4_spill] sm:$0xff] }
 0x739   : > { %v2179_v0 = vpop.f32.mrf.mxu3 }
 0x73a   : > { %v2256_v53 = vadd.f32 %v2179_v0, %v1625_v27  ;;  %v2072_v5 = vmax.f32 %v2023_v50, 0.0  ;;  %v1943_v27 = vpop.f32.mrf.mxu1  ;;  %v4163_v0 = vld [vmem:[#allocation19_spill] sm:$0xff] }
 0x73b   : > { %v1630_v20 = vadd.f32 %v4163_v0, %v4162_v9 }
 0x73c   : > { %v2292_v37 = vadd.f32 %v3911_v13, %v2256_v53 }
 0x73e   : > { %2324 = vst [vmem:[%s3919_s7 + $0x10] sm:$0xff] %v2292_v37  ;;  %v1939_v37 = vadd.f32 %v3850_v6, %v1938_v48 }
 0x73f   : > { %v2024_v36 = vpop.f32.mrf.mxu2 }
 0x740   : > { %v2025_v10 = vadd.f32 %v2024_v36, %v1936_v41 }
 0x741   : > { %v2181_v32 = vpop.f32.mrf.mxu3 }
 0x742   : > { %v2073_v26 = vmax.f32 %v2025_v10, 0.0  ;;  %v2257_v56 = vadd.f32 %v2181_v32, %v1627_v28  ;;  %v1945_v28 = vpop.f32.mrf.mxu1  ;;  %v4164_v10 = vld [vmem:[#allocation5_spill] sm:$0xff]  ;;  %v4165_v32 = vld [vmem:[#allocation20_spill] sm:$0xff] }
 0x744   : > { %v2094_v12 = vpack.c.bf16 %v2073_v26, %v2072_v5  ;;  %v2293_v58 = vadd.f32 %v3911_v13, %v2257_v56  ;;  %v1632_v5 = vadd.f32 %v4165_v32, %v4164_v10  ;;  %v1946_v10 = vadd.f32 %v3850_v6, %v1945_v28 }
 0x745   : > { %v1640_v28 = vadd.f32 %v3775_v39, %v3733_v62 }
 0x746   : > { %2325 = vst [vmem:[%s3919_s7 + $0x18] sm:$0xff] %v2293_v58  ;;  %2223 = vmatmul.bf16.gmra.mxu3 %v2094_v12 }
 0x747   : > { %v2027_v49 = vpop.f32.mrf.mxu2 }
 0x748   : > { %v2028_v50 = vadd.f32 %v2027_v49, %v1939_v37 }
 0x749   : > { %v2184_v53 = vpop.f32.mrf.mxu3 }
 0x74a   : > { %v2258_v41 = vadd.f32 %v2184_v53, %v1630_v20  ;;  %v2074_v12 = vmax.f32 %v2028_v50, 0.0  ;;  %v4166_v20 = vld [vmem:[#allocation6_spill] sm:$0xff]  ;;  %v4167_v53 = vld [vmem:[#allocation21_spill] sm:$0xff] }
 0x74b   : > { %v1635_v17 = vadd.f32 %v4167_v53, %v4166_v20 }
 0x74c   : > { %v2294_v36 = vadd.f32 %v3911_v13, %v2258_v41  ;;  %v1948_v41 = vpop.f32.mrf.mxu1 }
 0x74e   : > { %2326 = vst [vmem:[%s3919_s7 + $0x20] sm:$0xff] %v2294_v36  ;;  %v1944_v36 = vadd.f32 %v3850_v6, %v1943_v27 }
 0x74f   : > { %v2029_v8 = vpop.f32.mrf.mxu2 }
 0x750   : > { %v2030_v26 = vadd.f32 %v2029_v8, %v1941_v60 }
 0x751   : > { %v2186_v56 = vpop.f32.mrf.mxu3 }
 0x752   : > { %v2075_v58 = vmax.f32 %v2030_v26, 0.0  ;;  %v2259_v9 = vadd.f32 %v2186_v56, %v1632_v5  ;;  %v4168_v5 = vld [vmem:[#allocation7_spill] sm:$0xff] }
 0x753   : > { %v1637_v26 = vadd.f32 %v4168_v5, %v3717_v51 }
 0x754   : > { %v2095_v48 = vpack.c.bf16 %v2075_v58, %v2074_v12  ;;  %v2295_v0 = vadd.f32 %v3911_v13, %v2259_v9 }
 0x756   : > { %2327 = vst [vmem:[%s3919_s7 + $0x28] sm:$0xff] %v2295_v0  ;;  %2228 = vmatmul.bf16.gmra.mxu3 %v2095_v48  ;;  %v1950_v0 = vpop.f32.mrf.mxu1 }
 0x757   : > { %v2032_v49 = vpop.f32.mrf.mxu2 }
 0x758   : > { %v2033_v50 = vadd.f32 %v2032_v49, %v1944_v36 }
 0x759   : > { %v2189_v37 = vpop.f32.mrf.mxu3 }
 0x75a   : > { %v2260_v60 = vadd.f32 %v2189_v37, %v1635_v17  ;;  %v2076_v58 = vmax.f32 %v2033_v50, 0.0  ;;  %v1949_v17 = vadd.f32 %v3850_v6, %v1948_v41 }
 0x75c   : > { %v2296_v8 = vadd.f32 %v3911_v13, %v2260_v60 }
 0x75e   : > { %2328 = vst [vmem:[%s3919_s7 + $0x30] sm:$0xff] %v2296_v8  ;;  %v1953_v36 = vpop.f32.mrf.mxu1  ;;  %v1951_v8 = vadd.f32 %v3850_v6, %v1950_v0 }
 0x75f   : > { %v2034_v32 = vpop.f32.mrf.mxu2  ;;  %v1954_v0 = vadd.f32 %v3850_v6, %v1953_v36 }
 0x760   : > { %v2035_v56 = vadd.f32 %v2034_v32, %v1946_v10  ;;  %v1642_v10 = vadd.f32 %v3781_v55, %v3735_v29 }
 0x761   : > { %v2191_v12 = vpop.f32.mrf.mxu3 }
 0x762   : > { %v2077_v9 = vmax.f32 %v2035_v56, 0.0  ;;  %v2261_v48 = vadd.f32 %v2191_v12, %v1637_v26 }
 0x764   : > { %v2096_v27 = vpack.c.bf16 %v2077_v9, %v2076_v58  ;;  %v2297_v20 = vadd.f32 %v3911_v13, %v2261_v48  ;;  %v1645_v9 = vadd.f32 %v3785_v7, %v3738_v2 }
 0x766   : > { %2329 = vst [vmem:[%s3919_s7 + $0x38] sm:$0xff] %v2297_v20  ;;  %2233 = vmatmul.bf16.gmra.mxu3 %v2096_v27  ;;  %v1955_v58 = vpop.f32.mrf.mxu1 }
 0x767   : > { %v2037_v49 = vpop.f32.mrf.mxu2  ;;  %v1956_v20 = vadd.f32 %v3850_v6, %v1955_v58 }
 0x768   : > { %v2038_v60 = vadd.f32 %v2037_v49, %v1949_v17 }
 0x769   : > { %v2194_v53 = vpop.f32.mrf.mxu3 }
 0x76a   : > { %v2262_v51 = vadd.f32 %v2194_v53, %v1640_v28  ;;  %v2078_v62 = vmax.f32 %v2038_v60, 0.0  ;;  %v1647_v28 = vadd.f32 %v3790_v31, %v3741_v1 }
 0x76c   : > { %v2298_v37 = vadd.f32 %v3911_v13, %v2262_v51 }
 0x76e   : > { %2330 = vst [vmem:[%s3919_s7 + $0x40] sm:$0xff] %v2298_v37  ;;  %v1958_v51 = vpop.f32.mrf.mxu1 }
 0x76f   : > { %v2039_v50 = vpop.f32.mrf.mxu2 }
 0x770   : > { %v2040_v32 = vadd.f32 %v2039_v50, %v1951_v8  ;;  %v1650_v50 = vadd.f32 %v3794_v52, %v3743_v63 }
 0x771   : > { %v2196_v5 = vpop.f32.mrf.mxu3 }
 0x772   : > { %v2079_v39 = vmax.f32 %v2040_v32, 0.0  ;;  %v2263_v26 = vadd.f32 %v2196_v5, %v1642_v10  ;;  %v1959_v32 = vadd.f32 %v3850_v6, %v1958_v51  ;;  %v1665_v51 = vadd.f32 %v3854_v38, %v3759_v34 }
 0x774   : > { %v2097_v41 = vpack.c.bf16 %v2079_v39, %v2078_v62  ;;  %v2299_v56 = vadd.f32 %v3911_v13, %v2263_v26 }
 0x776   : > { %2331 = vst [vmem:[%s3919_s7 + $0x48] sm:$0xff] %v2299_v56  ;;  %2238 = vmatmul.bf16.gmra.mxu3 %v2097_v41  ;;  %v1960_v31 = vpop.f32.mrf.mxu1  ;;  %v1652_v41 = vadd.f32 %v3808_v54, %v3746_v42  ;;  %v1657_v42 = vadd.f32 %v3830_v3, %v3751_v57 }
 0x777   : > { %v2042_v12 = vpop.f32.mrf.mxu2  ;;  %v1961_v39 = vadd.f32 %v3850_v6, %v1960_v31  ;;  %v1655_v6 = vadd.f32 %v3820_v35, %v3749_v15 }
 0x778   : > { %v2043_v27 = vadd.f32 %v2042_v12, %v1954_v0 }
 0x779   : > { %v2199_v48 = vpop.f32.mrf.mxu3 }
 0x77a   : > { %v2264_v29 = vadd.f32 %v2199_v48, %v1645_v9  ;;  %v2080_v2 = vmax.f32 %v2043_v27, 0.0 }
 0x77c   : > { %v2300_v55 = vadd.f32 %v3911_v13, %v2264_v29 }
 0x77e   : > { %2332 = vst [vmem:[%s3919_s7 + $0x50] sm:$0xff] %v2300_v55 }
 0x77f   : > { %v2044_v49 = vpop.f32.mrf.mxu2 }
 0x780   : > { %v2045_v53 = vadd.f32 %v2044_v49, %v1956_v20  ;;  %v1660_v49 = vadd.f32 %v3839_v44, %v3754_v4 }
 0x781   : > { %v2201_v17 = vpop.f32.mrf.mxu3 }
 0x782   : > { %v2081_v7 = vmax.f32 %v2045_v53, 0.0  ;;  %v2265_v37 = vadd.f32 %v2201_v17, %v1647_v28  ;;  %v1662_v53 = vadd.f32 %v3844_v22, %v3756_v59 }
 0x784   : > { %v2098_v36 = vpack.c.bf16 %v2081_v7, %v2080_v2  ;;  %v2301_v60 = vadd.f32 %v3911_v13, %v2265_v37  ;;  %v1667_v7 = vadd.f32 %v3858_v61, %v3763_v40 }
 0x786   : > { %2333 = vst [vmem:[%s3919_s7 + $0x58] sm:$0xff] %v2301_v60  ;;  %2243 = vmatmul.bf16.gmra.mxu3 %v2098_v36  ;;  %v1670_v36 = vadd.f32 %v3862_v43, %v3765_v24 }
 0x787   : > { %v2047_v8 = vpop.f32.mrf.mxu2 }
 0x788   : > { %v2048_v62 = vadd.f32 %v2047_v8, %v1959_v32  ;;  %v1672_v8 = vadd.f32 %v3866_v14, %v3769_v23 }
 0x789   : > { %v2204_v10 = vpop.f32.mrf.mxu3 }
 0x78a   : > { %v2266_v1 = vadd.f32 %v2204_v10, %v1650_v50  ;;  %v2082_v63 = vmax.f32 %v2048_v62, 0.0  ;;  %v1675_v10 = vadd.f32 %v3870_v11, %v3773_v46 }
 0x78c   : > { %v2302_v5 = vadd.f32 %v3911_v13, %v2266_v1  ;;  %v1677_v1 = vadd.f32 %v3874_v30, %v3777_v19 }
 0x78e   : > { %2334 = vst [vmem:[%s3919_s7 + $0x60] sm:$0xff] %v2302_v5  ;;  %v1680_v5 = vadd.f32 %v3878_v47, %v3783_v25 }
 0x78f   : > { %v2049_v26 = vpop.f32.mrf.mxu2 }
 0x790   : > { %v2050_v56 = vadd.f32 %v2049_v26, %v1961_v39  ;;  %v1682_v39 = vadd.f32 %v3882_v21, %v3787_v33 }
 0x791   : > { %v2206_v12 = vpop.f32.mrf.mxu3 }
 0x792   : > { %v2083_v52 = vmax.f32 %v2050_v56, 0.0  ;;  %v2267_v58 = vadd.f32 %v2206_v12, %v1652_v41  ;;  %v1685_v41 = vadd.f32 %v3886_v16, %v3792_v18  ;;  %v4169_v12 = vld [vmem:[#allocation14_spill] sm:$0xff] }
 0x794   : > { %v2099_v9 = vpack.c.bf16 %v2083_v52, %v2082_v63  ;;  %v2303_v48 = vadd.f32 %v3911_v13, %v2267_v58  ;;  %v1687_v63 = vadd.f32 %v4169_v12, %v3803_v45  ;;  %v4170_v58 = vld [vmem:[#allocation8_spill] sm:$0xff] }
 0x796   : > { %2335 = vst [vmem:[%s3919_s7 + $0x68] sm:$0xff] %v2303_v48  ;;  %2248 = vmatmul.bf16.gmra.mxu3 %v2099_v9  ;;  %v4171_v9 = vld [vmem:[#allocation22_spill] sm:$0xff] }
 0x797   : > { %v1690_v48 = vadd.f32 %v4171_v9, %v4170_v58 }
 0x799   : > { %v2209_v0 = vpop.f32.mrf.mxu3 }
 0x79a   : > { %v2268_v29 = vadd.f32 %v2209_v0, %v1655_v6  ;;  %v4172_v0 = vld [vmem:[#allocation10_spill] sm:$0xff] }
 0x79c   : > { %v2304_v55 = vadd.f32 %v3911_v13, %v2268_v29  ;;  %v4173_v29 = vld [vmem:[#allocation23_spill] sm:$0xff] }
 0x79e   : > { %2336 = vst [vmem:[%s3919_s7 + $0x70] sm:$0xff] %v2304_v55  ;;  %v1692_v55 = vadd.f32 %v4173_v29, %v4172_v0 }
 0x7a1   : > { %v2211_v54 = vpop.f32.mrf.mxu3 }
 0x7a2   : > { %v2269_v27 = vadd.f32 %v2211_v54, %v1657_v42 }
 0x7a4   : > { %v2305_v20 = vadd.f32 %v3911_v13, %v2269_v27  ;;  %v4174_v27 = vld [vmem:[#allocation12_spill] sm:$0xff] }
 0x7a6   : > { %2337 = vst [vmem:[%s3919_s7 + $0x78] sm:$0xff] %v2305_v20  ;;  %v4175_v20 = vld [vmem:[#allocation24_spill] sm:$0xff] }
 0x7a9   : > { %v2214_v28 = vpop.f32.mrf.mxu3 }
 0x7aa   : > { %v2270_v15 = vadd.f32 %v2214_v28, %v1660_v49  ;;  %v1695_v49 = vadd.f32 %v4175_v20, %v4174_v27 }
 0x7ac   : > { %v2306_v35 = vadd.f32 %v3911_v13, %v2270_v15 }
 0x7ae   : > { %2338 = vst [vmem:[%s3919_s7 + $0x80] sm:$0xff] %v2306_v35 }
 0x7b1   : > { %v2216_v17 = vpop.f32.mrf.mxu3 }
 0x7b2   : > { %v2271_v57 = vadd.f32 %v2216_v17, %v1662_v53  ;;  %v4176_v53 = vld [vmem:[#allocation13_spill] sm:$0xff] }
 0x7b3   : > { %v4177_v17 = vld [vmem:[#allocation25_spill] sm:$0xff] }
 0x7b4   : > { %v2307_v3 = vadd.f32 %v3911_v13, %v2271_v57  ;;  %v1697_v57 = vadd.f32 %v4177_v17, %v4176_v53 }
 0x7b6   : > { %2339 = vst [vmem:[%s3919_s7 + $0x88] sm:$0xff] %v2307_v3 }
 0x7b9   : > { %v2219_v2 = vpop.f32.mrf.mxu3 }
 0x7ba   : > { %v2272_v4 = vadd.f32 %v2219_v2, %v1665_v51 }
 0x7bc   : > { %v2308_v44 = vadd.f32 %v3911_v13, %v2272_v4 }
 0x7be   : > { %2340 = vst [vmem:[%s3919_s7 + $0x90] sm:$0xff] %v2308_v44 }
 0x7c1   : > { %v2221_v37 = vpop.f32.mrf.mxu3 }
 0x7c2   : > { %v2273_v59 = vadd.f32 %v2221_v37, %v1667_v7 }
 0x7c4   : > { %v2309_v22 = vadd.f32 %v3911_v13, %v2273_v59 }
 0x7c6   : > { %2341 = vst [vmem:[%s3919_s7 + $0x98] sm:$0xff] %v2309_v22 }
 0x7c9   : > { %v2224_v60 = vpop.f32.mrf.mxu3 }
 0x7ca   : > { %v2274_v34 = vadd.f32 %v2224_v60, %v1670_v36 }
 0x7cc   : > { %v2310_v38 = vadd.f32 %v3911_v13, %v2274_v34 }
 0x7ce   : > { %2342 = vst [vmem:[%s3919_s7 + $0xa0] sm:$0xff] %v2310_v38 }
 0x7d1   : > { %v2226_v50 = vpop.f32.mrf.mxu3 }
 0x7d2   : > { %v2275_v40 = vadd.f32 %v2226_v50, %v1672_v8 }
 0x7d4   : > { %v2311_v61 = vadd.f32 %v3911_v13, %v2275_v40 }
 0x7d6   : > { %2343 = vst [vmem:[%s3919_s7 + $0xa8] sm:$0xff] %v2311_v61 }
 0x7d9   : > { %v2229_v32 = vpop.f32.mrf.mxu3 }
 0x7da   : > { %v2276_v24 = vadd.f32 %v2229_v32, %v1675_v10 }
 0x7dc   : > { %v2312_v43 = vadd.f32 %v3911_v13, %v2276_v24 }
 0x7de   : > { %2344 = vst [vmem:[%s3919_s7 + $0xb0] sm:$0xff] %v2312_v43 }
 0x7e1   : > { %v2231_v31 = vpop.f32.mrf.mxu3 }
 0x7e2   : > { %v2277_v23 = vadd.f32 %v2231_v31, %v1677_v1 }
 0x7e4   : > { %v2313_v14 = vadd.f32 %v3911_v13, %v2277_v23 }
 0x7e6   : > { %2345 = vst [vmem:[%s3919_s7 + $0xb8] sm:$0xff] %v2313_v14 }
 0x7e9   : > { %v2234_v62 = vpop.f32.mrf.mxu3 }
 0x7ea   : > { %v2278_v46 = vadd.f32 %v2234_v62, %v1680_v5 }
 0x7ec   : > { %v2314_v11 = vadd.f32 %v3911_v13, %v2278_v46 }
 0x7ee   : > { %2346 = vst [vmem:[%s3919_s7 + $0xc0] sm:$0xff] %v2314_v11 }
 0x7f1   : > { %v2236_v26 = vpop.f32.mrf.mxu3 }
 0x7f2   : > { %v2279_v19 = vadd.f32 %v2236_v26, %v1682_v39 }
 0x7f4   : > { %v2315_v30 = vadd.f32 %v3911_v13, %v2279_v19 }
 0x7f6   : > { %2347 = vst [vmem:[%s3919_s7 + $0xc8] sm:$0xff] %v2315_v30 }
 0x7f9   : > { %v2239_v56 = vpop.f32.mrf.mxu3 }
 0x7fa   : > { %v2280_v25 = vadd.f32 %v2239_v56, %v1685_v41 }
 0x7fc   : > { %v2316_v47 = vadd.f32 %v3911_v13, %v2280_v25 }
 0x7fe   : > { %2348 = vst [vmem:[%s3919_s7 + $0xd0] sm:$0xff] %v2316_v47 }
 0x801   : > { %v2241_v52 = vpop.f32.mrf.mxu3 }
 0x802   : > { %v2281_v33 = vadd.f32 %v2241_v52, %v1687_v63 }
 0x804   : > { %v2317_v21 = vadd.f32 %v3911_v13, %v2281_v33 }
 0x806   : > { %2349 = vst [vmem:[%s3919_s7 + $0xd8] sm:$0xff] %v2317_v21 }
 0x809   : > { %v2244_v6 = vpop.f32.mrf.mxu3 }
 0x80a   : > { %v2282_v18 = vadd.f32 %v2244_v6, %v1690_v48 }
 0x80c   : > { %v2318_v16 = vadd.f32 %v3911_v13, %v2282_v18 }
 0x80e   : > { %2350 = vst [vmem:[%s3919_s7 + $0xe0] sm:$0xff] %v2318_v16 }
 0x811   : > { %v2246_v42 = vpop.f32.mrf.mxu3 }
 0x812   : > { %v2283_v45 = vadd.f32 %v2246_v42, %v1692_v55 }
 0x814   : > { %v2319_v54 = vadd.f32 %v3911_v13, %v2283_v45 }
 0x816   : > { %2351 = vst [vmem:[%s3919_s7 + $0xe8] sm:$0xff] %v2319_v54 }
 0x819   : > { %v2249_v28 = vpop.f32.mrf.mxu3 }
 0x81a   : > { %v2284_v15 = vadd.f32 %v2249_v28, %v1695_v49 }
 0x81c   : > { %v2320_v35 = vadd.f32 %v3911_v13, %v2284_v15 }
 0x81e   : > { %2352 = vst [vmem:[%s3919_s7 + $0xf0] sm:$0xff] %v2320_v35 }
 0x821   : > { %v2251_v3 = vpop.f32.mrf.mxu3 }
 0x822   : > { %v2285_v51 = vadd.f32 %v2251_v3, %v1697_v57 }
 0x824   : > { %v2321_v2 = vadd.f32 %v3911_v13, %v2285_v51 }
 0x826   : > { %2353 = vst [vmem:[%s3919_s7 + $0xf8] sm:$0xff] %v2321_v2 }
 0x827 PF: > { %s16_s21 = sadd.s32 1, %s3001_s21  }
 0x828   : > { %p13_p4 = scmp.ge.s32.totalorder %s16_s21, 4  }
 0x82a   :  { %15 = sbr.rel (!%p13_p4) target bundleno = 1 (0x1), region = 83 }

</bundles_post_ra>
